<compile_context>
chip_gen: v5e
topology: v5e:2x2
jax: 0.10.0
libtpu: 0.0.40
codegen_flags: <defaults>
</compile_context>

<pallas_src>
import jax
import jax.numpy as jnp
from jax.experimental import pallas as pl
from jax.experimental.pallas import tpu as pltpu

IN_DIM = 256
HID_DIM = IN_DIM * 2      # 512
OUT_DIM = 71
OUT_PAD = 128             # lane-dense padded output width
EPS = 1e-5

_MAX_VMEM_BYTES = 48 * 1024 * 1024   # stay well under v7x's 64 MiB physical VMEM


def _bn_relu(h, gamma, beta):
    """Training-mode BatchNorm1d + ReLU, folded form, single-pass stats.

    h: [B, F] f32, gamma/beta: [1, F] f32.
    """
    mean = jnp.mean(h, axis=0, keepdims=True)                 # E[x]
    mean_sq = jnp.mean(h * h, axis=0, keepdims=True)          # E[x^2]
    var = jnp.maximum(mean_sq - mean * mean, 0.0)              # biased var
    scale = gamma * jax.lax.rsqrt(var + EPS)                   # [1, F]
    shift = beta - mean * scale                                # [1, F]
    return jnp.maximum(h * scale + shift, 0.0)                 # one FMA / elem


def decoder_kernel(z_ref,
                   w1_ref, g1_ref, be1_ref,
                   w2_ref, g2_ref, be2_ref,
                   w3_ref, b3_ref,
                   o_ref):
    # Linear(256 -> 512) [bias dropped: cancelled by BN] + BN + ReLU
    z = z_ref[...].astype(jnp.bfloat16)                               # [B, 256]
    h1 = jnp.dot(z, w1_ref[...], preferred_element_type=jnp.float32)  # [B, 512] f32
    h1 = _bn_relu(h1, g1_ref[...], be1_ref[...])

    # Linear(512 -> 256) [bias dropped] + BN + ReLU
    h2 = jnp.dot(h1.astype(jnp.bfloat16), w2_ref[...],
                 preferred_element_type=jnp.float32)                  # [B, 256] f32
    h2 = _bn_relu(h2, g2_ref[...], be2_ref[...])

    # Linear(256 -> 128 padded) + Sigmoid (elementwise math in f32)
    logits = jnp.dot(h2.astype(jnp.bfloat16), w3_ref[...],
                     preferred_element_type=jnp.float32) + b3_ref[...]
    o_ref[...] = jax.nn.sigmoid(logits)                               # [B, 128]


def health_decoder_forward(z, params):
    """z: [B, 256] f32 -> [B, 71] f32."""
    B = z.shape[0]

    # Generous VMEM estimate: bf16 weights (~0.6 MiB) + per-row activations /
    # temporaries.  Guard so the monolithic no-grid kernel never exceeds what
    # fits on v7x (64 MiB physical VMEM).
    est = 4 * 1024 * 1024 + B * 32 * 1024
    if est > _MAX_VMEM_BYTES:
        raise ValueError(
            f"batch={B} too large for the single-tile health_decoder kernel; "
            "use a tiled two-pass-BN variant for large batches.")
    vmem_limit = min(_MAX_VMEM_BYTES, max(est, 16 * 1024 * 1024))

    # Lane-pad the last layer 71 -> 128 (zeros; padded sigmoid lanes sliced off).
    w3p = jnp.pad(params["w3"], ((0, 0), (0, OUT_PAD - OUT_DIM)))
    b3p = jnp.pad(params["b3"], ((0, 0), (0, OUT_PAD - OUT_DIM)))

    vmem = pl.BlockSpec(memory_space=pltpu.VMEM)   # whole-array blocks in VMEM
    out_padded = pl.pallas_call(
        decoder_kernel,
        out_shape=jax.ShapeDtypeStruct((B, OUT_PAD), jnp.float32),
        in_specs=[vmem] * 9,
        out_specs=vmem,
        compiler_params=pltpu.CompilerParams(vmem_limit_bytes=vmem_limit),
    )(z,
      params["w1"], params["g1"], params["be1"],
      params["w2"], params["g2"], params["be2"],
      w3p, b3p)
    return out_padded[:, :OUT_DIM]


def init_params(key):
    """PyTorch-default init.  Weights stored [in, out] in bf16 for the MXU;
    BN params and biases in f32.  b1/b2 are kept only for the faithful
    reference — they are mathematically dead under training-mode BN and are
    not passed to the kernel."""
    ks = jax.random.split(key, 6)

    def linear(kw, kb, fan_in, fan_out):
        bound = 1.0 / jnp.sqrt(jnp.float32(fan_in))
        w = jax.random.uniform(kw, (fan_in, fan_out), jnp.float32, -bound, bound)
        b = jax.random.uniform(kb, (1, fan_out), jnp.float32, -bound, bound)
        return w, b

    w1, b1 = linear(ks[0], ks[1], IN_DIM, HID_DIM)
    w2, b2 = linear(ks[2], ks[3], HID_DIM, IN_DIM)
    w3, b3 = linear(ks[4], ks[5], IN_DIM, OUT_DIM)

    return dict(
        w1=w1.astype(jnp.bfloat16), b1=b1,
        g1=jnp.ones((1, HID_DIM), jnp.float32), be1=jnp.zeros((1, HID_DIM), jnp.float32),
        w2=w2.astype(jnp.bfloat16), b2=b2,
        g2=jnp.ones((1, IN_DIM), jnp.float32), be2=jnp.zeros((1, IN_DIM), jnp.float32),
        w3=w3.astype(jnp.bfloat16), b3=b3,
    )


def reference_forward_exact(z, p):
    """Pure-JAX mirror of the kernel math (bf16 matmul operands, f32 accum,
    folded one-pass BN, pre-BN biases dropped).  Tight-tolerance check."""
    def bn_relu(h, g, be):
        m = jnp.mean(h, axis=0, keepdims=True)
        ms = jnp.mean(h * h, axis=0, keepdims=True)
        v = jnp.maximum(ms - m * m, 0.0)
        s = g * jax.lax.rsqrt(v + EPS)
        return jnp.maximum(h * s + (be - m * s), 0.0)

    def dot(a, w):
        return jnp.dot(a.astype(jnp.bfloat16), w, preferred_element_type=jnp.float32)

    h1 = bn_relu(dot(z, p["w1"]), p["g1"], p["be1"])
    h2 = bn_relu(dot(h1, p["w2"]), p["g2"], p["be2"])
    return jax.nn.sigmoid(dot(h2, p["w3"]) + p["b3"])


def reference_forward_pytorch(z, p):
    """Literal PyTorch training-mode forward in f32 (with pre-BN biases and
    two-pass batch variance).  Loose-tolerance semantic check — differences
    vs. the kernel come only from the bf16 matmul operands."""
    def bn_relu(h, g, be):
        m = jnp.mean(h, axis=0, keepdims=True)
        v = jnp.mean((h - m) ** 2, axis=0, keepdims=True)
        return jnp.maximum((h - m) / jnp.sqrt(v + EPS) * g + be, 0.0)

    w1 = p["w1"].astype(jnp.float32)
    w2 = p["w2"].astype(jnp.float32)
    w3 = p["w3"].astype(jnp.float32)
    h1 = bn_relu(z @ w1 + p["b1"], p["g1"], p["be1"])
    h2 = bn_relu(h1 @ w2 + p["b2"], p["g2"], p["be2"])
    return jax.nn.sigmoid(h2 @ w3 + p["b3"])


if __name__ == "__main__":
    key = jax.random.PRNGKey(0)
    kz, kp = jax.random.split(key)

    B = 8
    z = jax.random.normal(kz, (B, IN_DIM), jnp.float32)
    params = init_params(kp)

    out = health_decoder_forward(z, params)
    out = jax.block_until_ready(out)
    assert out.shape == (B, OUT_DIM)

    ref = reference_forward_exact(z, params)
    assert jnp.allclose(out, ref, atol=1e-4, rtol=1e-4), \
        f"mismatch vs exact reference: max abs err {jnp.max(jnp.abs(out - ref))}"

    ref_pt = reference_forward_pytorch(z, params)
    assert jnp.allclose(out, ref_pt, atol=1e-2), \
        f"mismatch vs PyTorch-faithful f32 reference: max abs err {jnp.max(jnp.abs(out - ref_pt))}"

    print("KERNEL_OK")
</pallas_src>

<mosaic_0001>
module attributes {stable_mosaic.version = 11 : i64} {
  func.func @decoder_kernel(%arg0: memref<8x256xf32, #tpu.memory_space<vmem>>, %arg1: memref<256x512xbf16, #tpu.memory_space<vmem>>, %arg2: memref<1x512xf32, #tpu.memory_space<vmem>>, %arg3: memref<1x512xf32, #tpu.memory_space<vmem>>, %arg4: memref<512x256xbf16, #tpu.memory_space<vmem>>, %arg5: memref<1x256xf32, #tpu.memory_space<vmem>>, %arg6: memref<1x256xf32, #tpu.memory_space<vmem>>, %arg7: memref<256x128xbf16, #tpu.memory_space<vmem>>, %arg8: memref<1x128xf32, #tpu.memory_space<vmem>>, %arg9: memref<8x128xf32, #tpu.memory_space<vmem>>) attributes {dimension_semantics = [], scalar_prefetch = 0 : i64, scratch_operands = 0 : i64, tpu.core_type = #tpu.core_type<tc>} {
    %c0 = arith.constant 0 : index
    %c0_0 = arith.constant 0 : index
    %0 = vector.load %arg0[%c0, %c0_0] : memref<8x256xf32, #tpu.memory_space<vmem>>, vector<8x256xf32>
    %1 = arith.truncf %0 : vector<8x256xf32> to vector<8x256xbf16>
    %c0_1 = arith.constant 0 : index
    %c0_2 = arith.constant 0 : index
    %2 = vector.load %arg1[%c0_1, %c0_2] : memref<256x512xbf16, #tpu.memory_space<vmem>>, vector<256x512xbf16>
    %cst = arith.constant dense<0.000000e+00> : vector<8x512xf32>
    %3 = tpu.matmul %1, %2, %cst {dimension_numbers = #tpu.dot_dimension_numbers<[1], [0], [0], [1], [0, 0, 1, 1], [], []>} : vector<8x256xbf16>, vector<256x512xbf16>, vector<8x512xf32> -> vector<8x512xf32>
    %c0_3 = arith.constant 0 : index
    %c0_4 = arith.constant 0 : index
    %4 = vector.load %arg2[%c0_3, %c0_4] : memref<1x512xf32, #tpu.memory_space<vmem>>, vector<1x512xf32>
    %c0_5 = arith.constant 0 : index
    %c0_6 = arith.constant 0 : index
    %5 = vector.load %arg3[%c0_5, %c0_6] : memref<1x512xf32, #tpu.memory_space<vmem>>, vector<1x512xf32>
    %cst_7 = arith.constant dense<0.000000e+00> : vector<512xf32>
    %6 = vector.multi_reduction <add>, %3, %cst_7 [0] : vector<8x512xf32> to vector<512xf32>
    %7 = vector.shape_cast %6 : vector<512xf32> to vector<1x512xf32>
    %cst_8 = arith.constant 8.000000e+00 : f32
    %8 = vector.broadcast %cst_8 : f32 to vector<1x512xf32>
    %9 = arith.divf %7, %8 : vector<1x512xf32>
    %10 = arith.mulf %3, %3 : vector<8x512xf32>
    %cst_9 = arith.constant dense<0.000000e+00> : vector<512xf32>
    %11 = vector.multi_reduction <add>, %10, %cst_9 [0] : vector<8x512xf32> to vector<512xf32>
    %12 = vector.shape_cast %11 : vector<512xf32> to vector<1x512xf32>
    %cst_10 = arith.constant 8.000000e+00 : f32
    %13 = vector.broadcast %cst_10 : f32 to vector<1x512xf32>
    %14 = arith.divf %12, %13 : vector<1x512xf32>
    %15 = arith.mulf %9, %9 : vector<1x512xf32>
    %16 = arith.subf %14, %15 : vector<1x512xf32>
    %cst_11 = arith.constant 0.000000e+00 : f32
    %17 = vector.broadcast %cst_11 : f32 to vector<1x512xf32>
    %18 = arith.maximumf %16, %17 : vector<1x512xf32>
    %cst_12 = arith.constant 9.99999974E-6 : f32
    %19 = vector.broadcast %cst_12 : f32 to vector<1x512xf32>
    %20 = arith.addf %18, %19 : vector<1x512xf32>
    %21 = math.rsqrt %20 : vector<1x512xf32>
    %22 = arith.mulf %4, %21 : vector<1x512xf32>
    %23 = arith.mulf %9, %22 : vector<1x512xf32>
    %24 = arith.subf %5, %23 : vector<1x512xf32>
    %25 = vector.broadcast %22 : vector<1x512xf32> to vector<8x512xf32>
    %26 = arith.mulf %3, %25 : vector<8x512xf32>
    %27 = vector.broadcast %24 : vector<1x512xf32> to vector<8x512xf32>
    %28 = arith.addf %26, %27 : vector<8x512xf32>
    %cst_13 = arith.constant 0.000000e+00 : f32
    %29 = vector.broadcast %cst_13 : f32 to vector<8x512xf32>
    %30 = arith.maximumf %28, %29 : vector<8x512xf32>
    %31 = arith.truncf %30 : vector<8x512xf32> to vector<8x512xbf16>
    %c0_14 = arith.constant 0 : index
    %c0_15 = arith.constant 0 : index
    %32 = vector.load %arg4[%c0_14, %c0_15] : memref<512x256xbf16, #tpu.memory_space<vmem>>, vector<512x256xbf16>
    %cst_16 = arith.constant dense<0.000000e+00> : vector<8x256xf32>
    %33 = tpu.matmul %31, %32, %cst_16 {dimension_numbers = #tpu.dot_dimension_numbers<[1], [0], [0], [1], [0, 0, 1, 1], [], []>} : vector<8x512xbf16>, vector<512x256xbf16>, vector<8x256xf32> -> vector<8x256xf32>
    %c0_17 = arith.constant 0 : index
    %c0_18 = arith.constant 0 : index
    %34 = vector.load %arg5[%c0_17, %c0_18] : memref<1x256xf32, #tpu.memory_space<vmem>>, vector<1x256xf32>
    %c0_19 = arith.constant 0 : index
    %c0_20 = arith.constant 0 : index
    %35 = vector.load %arg6[%c0_19, %c0_20] : memref<1x256xf32, #tpu.memory_space<vmem>>, vector<1x256xf32>
    %cst_21 = arith.constant dense<0.000000e+00> : vector<256xf32>
    %36 = vector.multi_reduction <add>, %33, %cst_21 [0] : vector<8x256xf32> to vector<256xf32>
    %37 = vector.shape_cast %36 : vector<256xf32> to vector<1x256xf32>
    %cst_22 = arith.constant 8.000000e+00 : f32
    %38 = vector.broadcast %cst_22 : f32 to vector<1x256xf32>
    %39 = arith.divf %37, %38 : vector<1x256xf32>
    %40 = arith.mulf %33, %33 : vector<8x256xf32>
    %cst_23 = arith.constant dense<0.000000e+00> : vector<256xf32>
    %41 = vector.multi_reduction <add>, %40, %cst_23 [0] : vector<8x256xf32> to vector<256xf32>
    %42 = vector.shape_cast %41 : vector<256xf32> to vector<1x256xf32>
    %cst_24 = arith.constant 8.000000e+00 : f32
    %43 = vector.broadcast %cst_24 : f32 to vector<1x256xf32>
    %44 = arith.divf %42, %43 : vector<1x256xf32>
    %45 = arith.mulf %39, %39 : vector<1x256xf32>
    %46 = arith.subf %44, %45 : vector<1x256xf32>
    %cst_25 = arith.constant 0.000000e+00 : f32
    %47 = vector.broadcast %cst_25 : f32 to vector<1x256xf32>
    %48 = arith.maximumf %46, %47 : vector<1x256xf32>
    %cst_26 = arith.constant 9.99999974E-6 : f32
    %49 = vector.broadcast %cst_26 : f32 to vector<1x256xf32>
    %50 = arith.addf %48, %49 : vector<1x256xf32>
    %51 = math.rsqrt %50 : vector<1x256xf32>
    %52 = arith.mulf %34, %51 : vector<1x256xf32>
    %53 = arith.mulf %39, %52 : vector<1x256xf32>
    %54 = arith.subf %35, %53 : vector<1x256xf32>
    %55 = vector.broadcast %52 : vector<1x256xf32> to vector<8x256xf32>
    %56 = arith.mulf %33, %55 : vector<8x256xf32>
    %57 = vector.broadcast %54 : vector<1x256xf32> to vector<8x256xf32>
    %58 = arith.addf %56, %57 : vector<8x256xf32>
    %cst_27 = arith.constant 0.000000e+00 : f32
    %59 = vector.broadcast %cst_27 : f32 to vector<8x256xf32>
    %60 = arith.maximumf %58, %59 : vector<8x256xf32>
    %61 = arith.truncf %60 : vector<8x256xf32> to vector<8x256xbf16>
    %c0_28 = arith.constant 0 : index
    %c0_29 = arith.constant 0 : index
    %62 = vector.load %arg7[%c0_28, %c0_29] : memref<256x128xbf16, #tpu.memory_space<vmem>>, vector<256x128xbf16>
    %cst_30 = arith.constant dense<0.000000e+00> : vector<8x128xf32>
    %63 = tpu.matmul %61, %62, %cst_30 {dimension_numbers = #tpu.dot_dimension_numbers<[1], [0], [0], [1], [0, 0, 1, 1], [], []>} : vector<8x256xbf16>, vector<256x128xbf16>, vector<8x128xf32> -> vector<8x128xf32>
    %c0_31 = arith.constant 0 : index
    %c0_32 = arith.constant 0 : index
    %64 = vector.load %arg8[%c0_31, %c0_32] : memref<1x128xf32, #tpu.memory_space<vmem>>, vector<1x128xf32>
    %65 = vector.broadcast %64 : vector<1x128xf32> to vector<8x128xf32>
    %66 = arith.addf %63, %65 : vector<8x128xf32>
    %67 = arith.negf %66 : vector<8x128xf32>
    %68 = math.exp %67 : vector<8x128xf32>
    %cst_33 = arith.constant 1.000000e+00 : f32
    %69 = vector.broadcast %cst_33 : f32 to vector<8x128xf32>
    %70 = arith.addf %69, %68 : vector<8x128xf32>
    %71 = arith.divf %69, %70 : vector<8x128xf32>
    %c0_34 = arith.constant 0 : index
    %c0_35 = arith.constant 0 : index
    %72 = vector.load %arg9[%c0_34, %c0_35] : memref<8x128xf32, #tpu.memory_space<vmem>>, vector<8x128xf32>
    tpu.vector_store %arg9[%c0_34, %c0_35], %71 {strides = array<i32>} : memref<8x128xf32, #tpu.memory_space<vmem>>, vector<8x128xf32>,
    return
  }
}

</mosaic_0001>

<bundles_post_ra>
// kernel: tpu_custom_call.1
= control target key start
LH: loop header
LB: loop body
LE: loop exit
PB: predicated region body
PF: predicated region fallthrough
CT: control target
= control target key end

     0   :  { %14 = vsyncpa [#allocation3], 0  ;;  %s2794_s0 = inlined_call_operand.hbm [shape: f32[8,256], index: 0, kind: input, shape index: {}]   ;;  %s2795_s1 = inlined_call_operand.hbm [shape: bf16[256,512], index: 1, kind: input, shape index: {}]   ;;  %s2796_s2 = inlined_call_operand.hbm [shape: f32[1,512], index: 2, kind: input, shape index: {}]   ;;  %s2797_s3 = inlined_call_operand.hbm [shape: f32[1,512], index: 3, kind: input, shape index: {}]   ;;  %s2798_s4 = inlined_call_operand.hbm [shape: bf16[512,256], index: 4, kind: input, shape index: {}]   ;;  %s2799_s5 = inlined_call_operand.vmem [shape: f32[1,256], index: 5, kind: input, shape index: {}]   ;;  %s2800_s6 = inlined_call_operand.vmem [shape: f32[1,256], index: 6, kind: input, shape index: {}]   ;;  %s2801_s7 = inlined_call_operand.hbm [shape: bf16[256,128], index: 7, kind: input, shape index: {}]   ;;  %s2802_s8 = inlined_call_operand.vmem [shape: f32[1,128], index: 8, kind: input, shape index: {}]   ;;  %s2803_s9 = inlined_call_operand.hbm [shape: f32[8,128], index: 9, kind: output, shape index: {}]  }
   0x1   :  { %15 = vsyncpa [#allocation6], 0 }
   0x2   :  { %16 = vsyncpa [#allocation9], 0 }
   0x3   :  { %17 = vsyncpa [#allocation12], 0  ;;  %s34_s11 = sshll.u32 %s2795_s1, 4  ;;  %s35_s11 = int_to_ptr.hbm [resolvable:$true] %s34_s11 }
   0x4   :  { %18 = vsyncpa [#allocation4], 0  ;;  %s2513_s12 = smov [#allocation5]   ;;  %s59_s16 = sshll.u32 %s2797_s3, 4  ;;  %s60_s16 = int_to_ptr.hbm [resolvable:$true] %s59_s16 }
   0x5   :  { %s36_s13 = sshll.u32 %s2513_s12, 4  ;;  %s2514_s17 = smov 256   ;;  %s37_s13 = int_to_ptr.vmem [resolvable:$true] %s36_s13 }
   0x6   :  { %s2515_s18 = smov 16   ;;  %s2516_s19 = smov [#allocation8]  }
   0x7   :  { %42 = dma.hbm_to_vmem [thread:$0]  %s35_s11, 8192, %s37_s13, [#allocation6], %s2514_s17, %s2514_s17, %s2515_s18  }
   0x8   :  { %s61_s20 = sshll.u32 %s2516_s19, 4  ;;  %s24_s23 = sshll.u32 %s2794_s0, 4  ;;  %s62_s20 = int_to_ptr.vmem [resolvable:$true] %s61_s20  ;;  %s25_s23 = int_to_ptr.hbm [resolvable:$true] %s24_s23 }
   0x9   :  { %64 = dma.hbm_to_vmem [thread:$0]  %s60_s16, 64, %s62_s20, [#allocation9]  }
   0xa   :  { %s48_s25 = sshll.u32 %s2796_s2, 4  ;;  %s2517_s26 = smov [#allocation2]   ;;  %s49_s25 = int_to_ptr.hbm [resolvable:$true] %s48_s25 }
   0xb   :  { %s26_s27 = sshll.u32 %s2517_s26, 4  ;;  %s2518_s3 = smov [#allocation7]   ;;  %s27_s27 = int_to_ptr.vmem [resolvable:$true] %s26_s27 }
   0xc   :  { %29 = dma.hbm_to_vmem [thread:$0]  %s25_s23, 256, %s27_s27, [#allocation3]  }
   0xd   :  { %s50_s28 = sshll.u32 %s2518_s3, 4  ;;  %s69_s10 = sshll.u32 %s2798_s4, 4  ;;  %s51_s28 = int_to_ptr.vmem [resolvable:$true] %s50_s28  ;;  %s70_s10 = int_to_ptr.hbm [resolvable:$true] %s69_s10 }
   0xe   :  { %53 = dma.hbm_to_vmem [thread:$0]  %s49_s25, 64, %s51_s28, [#allocation6]  }
   0xf   :  { %s2519_s0 = smov [#allocation10]   ;;  %s86_s2 = sshll.u32 %s2801_s7, 4  ;;  %s87_s2 = int_to_ptr.hbm [resolvable:$true] %s86_s2 }
  0x10   :  { %s71_s11 = sshll.u32 %s2519_s0, 4  ;;  %s2520_s14 = smov 128   ;;  %s72_s11 = int_to_ptr.vmem [resolvable:$true] %s71_s11 }
  0x11   :  { %s2521_s15 = smov 8   ;;  %s2522_s16 = smov [#allocation11]  }
  0x12   :  { %77 = dma.hbm_to_vmem [thread:$0]  %s70_s10, 8192, %s72_s11, [#allocation9], %s2520_s14, %s2520_s14, %s2521_s15  }
  0x13   :  { %s88_s17 = sshll.u32 %s2522_s16, 4  ;;  %s2523_s18 = smov 64   ;;  %s89_s17 = int_to_ptr.vmem [resolvable:$true] %s88_s17 }
  0x14   :  { %s2524_s19 = smov 4  }
  0x15   :  { %94 = dma.hbm_to_vmem [thread:$0]  %s87_s2, 2048, %s89_s17, [#allocation12], %s2523_s18, %s2523_s18, %s2524_s19  }
  0x16   :  { %2503 = dma.done.wait [#allocation3], 256  }
  0x17   :  { %2504 = vsyncadd [#allocation3], 4294967040 }
  0x18   :  { %2505 = dma.done.wait [#allocation6], 8256  }
  0x19   :  { %2506 = vsyncadd [#allocation6], 4294959040 }
  0x1a   :  { %2507 = dma.done.wait [#allocation9], 8256  }
  0x1b   :  { %2508 = vsyncadd [#allocation9], 4294959040 }
  0x1c   :  { %2509 = dma.done.wait [#allocation12], 2048  }
  0x1d   :  { %2510 = vsyncadd [#allocation12], 4294965248  ;;  %v1695_v0 = vld [vmem:[#allocation5 + $0xe0] sm:$0xf]  ;;  %v2188_v1 = vld [vmem:[#allocation5 + $0xec] sm:$0xf0] }
  0x1e   :  { %v1823_v2 = vld [vmem:[#allocation5 + $0x1e0] sm:$0xf]  ;;  %v1696_v3 = vor.u32 %v2188_v1, %v1695_v0  ;;  %v2220_v4 = vld [vmem:[#allocation5 + $0x1ec] sm:$0xf0]  ;;  %v2186_v5 = vld [vmem:[#allocation5 + $0xe4] sm:$0xf] }
  0x1f   :  { %v1697_v6 = vld [vmem:[#allocation5 + $0xf0] sm:$0xf0]  ;;  %v1824_v7 = vor.u32 %v2220_v4, %v1823_v2  ;;  %v2218_v9 = vld [vmem:[#allocation5 + $0x1e4] sm:$0xf]  ;;  %v1679_v11 = vld [vmem:[#allocation5 + $0xc0] sm:$0xf] }
  0x20   :  { %v1700_v8 = vor.u32 %v2186_v5, %v1697_v6  ;;  %v1825_v10 = vld [vmem:[#allocation5 + $0x1f0] sm:$0xf0]  ;;  %509 = vmatpush.bf16.msra.mxu0 %v1696_v3  ;;  %v2184_v13 = vld [vmem:[#allocation5 + $0xcc] sm:$0xf0]  ;;  %v1807_v14 = vld [vmem:[#allocation5 + $0x1c0] sm:$0xf] }
  0x21   :  { %v1828_v12 = vor.u32 %v2218_v9, %v1825_v10  ;;  %v2216_v15 = vld [vmem:[#allocation5 + $0x1cc] sm:$0xf0]  ;;  %522 = vmatpush.bf16.msra.mxu1 %v1824_v7  ;;  %v1680_v16 = vor.u32 %v2184_v13, %v1679_v11  ;;  %v2182_v18 = vld [vmem:[#allocation5 + $0xc4] sm:$0xf]  ;;  %v1681_v19 = vld [vmem:[#allocation5 + $0xd0] sm:$0xf0] }
  0x22   :  { %535 = vmatpush.bf16.msra.mxu2 %v1700_v8  ;;  %v1808_v17 = vor.u32 %v2216_v15, %v1807_v14  ;;  %v2214_v20 = vld [vmem:[#allocation5 + $0x1c4] sm:$0xf]  ;;  %v1684_v21 = vor.u32 %v2182_v18, %v1681_v19  ;;  %v1809_v22 = vld [vmem:[#allocation5 + $0x1d0] sm:$0xf0]  ;;  %v1663_v23 = vld [vmem:[#allocation5 + $0xa0] sm:$0xf] }
  0x23   :  { %548 = vmatpush.bf16.msra.mxu3 %v1828_v12  ;;  %v2180_v24 = vld [vmem:[#allocation5 + $0xac] sm:$0xf0]  ;;  %v1812_v25 = vor.u32 %v2214_v20, %v1809_v22  ;;  %v1791_v26 = vld [vmem:[#allocation5 + $0x1a0] sm:$0xf]  ;;  %v2178_v28 = vld [vmem:[#allocation5 + $0xa4] sm:$0xf] }
  0x24   :  { %v2212_v27 = vld [vmem:[#allocation5 + $0x1ac] sm:$0xf0]  ;;  %510 = vmatpush.bf16.msra.mxu0 %v1680_v16  ;;  %v1664_v29 = vor.u32 %v2180_v24, %v1663_v23  ;;  %v1665_v30 = vld [vmem:[#allocation5 + $0xb0] sm:$0xf0]  ;;  %v2210_v31 = vld [vmem:[#allocation5 + $0x1a4] sm:$0xf] }
  0x25   :  { %v1793_v32 = vld [vmem:[#allocation5 + $0x1b0] sm:$0xf0]  ;;  %523 = vmatpush.bf16.msra.mxu1 %v1808_v17  ;;  %v1792_v33 = vor.u32 %v2212_v27, %v1791_v26  ;;  %v1668_v34 = vor.u32 %v2178_v28, %v1665_v30  ;;  %v1647_v35 = vld [vmem:[#allocation5 + $0x80] sm:$0xf]  ;;  %v2176_v36 = vld [vmem:[#allocation5 + $0x8c] sm:$0xf0] }
  0x26   :  { %536 = vmatpush.bf16.msra.mxu2 %v1684_v21  ;;  %v1775_v37 = vld [vmem:[#allocation5 + $0x180] sm:$0xf]  ;;  %v1796_v38 = vor.u32 %v2210_v31, %v1793_v32  ;;  %v2208_v39 = vld [vmem:[#allocation5 + $0x18c] sm:$0xf0]  ;;  %v2174_v40 = vld [vmem:[#allocation5 + $0x84] sm:$0xf]  ;;  %v1648_v44 = vor.u32 %v2176_v36, %v1647_v35 }
  0x27   :  { %549 = vmatpush.bf16.msra.mxu3 %v1812_v25  ;;  %v1649_v41 = vld [vmem:[#allocation5 + $0x90] sm:$0xf0]  ;;  %v2206_v42 = vld [vmem:[#allocation5 + $0x184] sm:$0xf]  ;;  %v1776_v45 = vor.u32 %v2208_v39, %v1775_v37  ;;  %v1631_v47 = vld [vmem:[#allocation5 + $0x60] sm:$0xf] }
  0x28   :  { %v1777_v43 = vld [vmem:[#allocation5 + $0x190] sm:$0xf0]  ;;  %511 = vmatpush.bf16.msra.mxu0 %v1664_v29  ;;  %v1652_v46 = vor.u32 %v2174_v40, %v1649_v41  ;;  %v2172_v48 = vld [vmem:[#allocation5 + $0x6c] sm:$0xf0]  ;;  %v1759_v49 = vld [vmem:[#allocation5 + $0x160] sm:$0xf] }
  0x29   :  { %524 = vmatpush.bf16.msra.mxu1 %v1792_v33  ;;  %v1780_v50 = vor.u32 %v2206_v42, %v1777_v43  ;;  %v2204_v51 = vld [vmem:[#allocation5 + $0x16c] sm:$0xf0]  ;;  %v2170_v52 = vld [vmem:[#allocation5 + $0x64] sm:$0xf]  ;;  %v1633_v53 = vld [vmem:[#allocation5 + $0x70] sm:$0xf0]  ;;  %v1632_v56 = vor.u32 %v2172_v48, %v1631_v47 }
  0x2a   :  { %537 = vmatpush.bf16.msra.mxu2 %v1668_v34  ;;  %v2202_v54 = vld [vmem:[#allocation5 + $0x164] sm:$0xf]  ;;  %v1761_v55 = vld [vmem:[#allocation5 + $0x170] sm:$0xf0]  ;;  %v1760_v57 = vor.u32 %v2204_v51, %v1759_v49  ;;  %v1636_v58 = vor.u32 %v2170_v52, %v1633_v53  ;;  %v1615_v59 = vld [vmem:[#allocation5 + $0x40] sm:$0xf] }
  0x2b   :  { %550 = vmatpush.bf16.msra.mxu3 %v1796_v38  ;;  %v2168_v60 = vld [vmem:[#allocation5 + $0x4c] sm:$0xf0]  ;;  %v1743_v61 = vld [vmem:[#allocation5 + $0x140] sm:$0xf]  ;;  %v1764_v62 = vor.u32 %v2202_v54, %v1761_v55  ;;  %v2166_v0 = vld [vmem:[#allocation5 + $0x44] sm:$0xf] }
  0x2c   :  { %512 = vmatpush.bf16.msra.mxu0 %v1648_v44  ;;  %v2200_v63 = vld [vmem:[#allocation5 + $0x14c] sm:$0xf0]  ;;  %v1617_v1 = vld [vmem:[#allocation5 + $0x50] sm:$0xf0]  ;;  %v2198_v2 = vld [vmem:[#allocation5 + $0x144] sm:$0xf]  ;;  %v1616_v4 = vor.u32 %v2168_v60, %v1615_v59 }
  0x2d   :  { %525 = vmatpush.bf16.msra.mxu1 %v1776_v45  ;;  %v1745_v3 = vld [vmem:[#allocation5 + $0x150] sm:$0xf0]  ;;  %v1744_v5 = vor.u32 %v2200_v63, %v1743_v61  ;;  %v1620_v6 = vor.u32 %v2166_v0, %v1617_v1  ;;  %v1599_v7 = vld [vmem:[#allocation5 + $0x20] sm:$0xf]  ;;  %v2164_v8 = vld [vmem:[#allocation5 + $0x2c] sm:$0xf0] }
  0x2e   :  { %538 = vmatpush.bf16.msra.mxu2 %v1652_v46  ;;  %v1727_v9 = vld [vmem:[#allocation5 + $0x120] sm:$0xf]  ;;  %v1748_v10 = vor.u32 %v2198_v2, %v1745_v3  ;;  %v2196_v11 = vld [vmem:[#allocation5 + $0x12c] sm:$0xf0]  ;;  %v2162_v12 = vld [vmem:[#allocation5 + $0x24] sm:$0xf]  ;;  %v1600_v16 = vor.u32 %v2164_v8, %v1599_v7 }
  0x2f   :  { %551 = vmatpush.bf16.msra.mxu3 %v1780_v50  ;;  %v1601_v13 = vld [vmem:[#allocation5 + $0x30] sm:$0xf0]  ;;  %v2194_v14 = vld [vmem:[#allocation5 + $0x124] sm:$0xf]  ;;  %v1583_v17 = vld [vmem:[#allocation5] sm:$0xf]  ;;  %v1728_v19 = vor.u32 %v2196_v11, %v1727_v9 }
  0x30   :  { %513 = vmatpush.bf16.msra.mxu0 %v1632_v56  ;;  %v1729_v15 = vld [vmem:[#allocation5 + $0x130] sm:$0xf0]  ;;  %v2160_v18 = vld [vmem:[#allocation5 + $0xc] sm:$0xf0]  ;;  %v1604_v20 = vor.u32 %v2162_v12, %v1601_v13  ;;  %v1711_v21 = vld [vmem:[#allocation5 + $0x100] sm:$0xf] }
  0x31   :  { %526 = vmatpush.bf16.msra.mxu1 %v1760_v57  ;;  %v2192_v22 = vld [vmem:[#allocation5 + $0x10c] sm:$0xf0]  ;;  %v2158_v23 = vld [vmem:[#allocation5 + $0x4] sm:$0xf]  ;;  %v1732_v24 = vor.u32 %v2194_v14, %v1729_v15  ;;  %v1585_v25 = vld [vmem:[#allocation5 + $0x10] sm:$0xf0]  ;;  %v1584_v31 = vor.u32 %v2160_v18, %v1583_v17 }
  0x32   :  { %539 = vmatpush.bf16.msra.mxu2 %v1636_v58  ;;  %v2190_v26 = vld [vmem:[#allocation5 + $0x104] sm:$0xf]  ;;  %v1713_v27 = vld [vmem:[#allocation5 + $0x110] sm:$0xf0]  ;;  %v1703_v28 = vld [vmem:[#allocation5 + $0xe8] sm:$0xf]  ;;  %v1712_v35 = vor.u32 %v2192_v22, %v1711_v21  ;;  %v1588_v36 = vor.u32 %v2158_v23, %v1585_v25 }
  0x33   :  { %552 = vmatpush.bf16.msra.mxu3 %v1764_v62  ;;  %v2189_v29 = vld [vmem:[#allocation5 + $0xf4] sm:$0xf0]  ;;  %v1831_v30 = vld [vmem:[#allocation5 + $0x1e8] sm:$0xf]  ;;  %v2187_v33 = vld [vmem:[#allocation5 + $0xec] sm:$0xf]  ;;  %v1716_v40 = vor.u32 %v2190_v26, %v1713_v27 }
  0x34   :  { %514 = vmatpush.bf16.msra.mxu0 %v1616_v4  ;;  %v2221_v32 = vld [vmem:[#allocation5 + $0x1f4] sm:$0xf0]  ;;  %v1705_v34 = vld [vmem:[#allocation5 + $0xf8] sm:$0xf0]  ;;  %v2219_v37 = vld [vmem:[#allocation5 + $0x1ec] sm:$0xf]  ;;  %v1704_v41 = vor.u32 %v2189_v29, %v1703_v28 }
  0x35   :  { %527 = vmatpush.bf16.msra.mxu1 %v1744_v5  ;;  %v1833_v38 = vld [vmem:[#allocation5 + $0x1f8] sm:$0xf0]  ;;  %v121_v39 = vld [vmem:[#allocation2] sm:$0xff]  ;;  %v1832_v43 = vor.u32 %v2221_v32, %v1831_v30  ;;  %v1708_v44 = vor.u32 %v2187_v33, %v1705_v34  ;;  %v1687_v45 = vld [vmem:[#allocation5 + $0xc8] sm:$0xf]  ;;  %vm745_vm5 = vcmask 1040384  }
  0x36   :  { %540 = vmatpush.bf16.msra.mxu2 %v1620_v6  ;;  %v122_v42 = vld [vmem:[#allocation2 + $0x8] sm:$0xff]  ;;  %v1815_v47 = vld [vmem:[#allocation5 + $0x1c8] sm:$0xf]  ;;  %v1836_v48 = vor.u32 %v2219_v37, %v1833_v38  ;;  %v2595_v49 = vpack.c.bf16 %v121_v39, %v121_v39  ;;  %v2183_v51 = vld [vmem:[#allocation5 + $0xcc] sm:$0xf]  ;;  %vm747_vm6 = vcmask 1042434  }
  0x37   :  { %553 = vmatpush.bf16.msra.mxu3 %v1748_v10  ;;  %v2185_v46 = vld [vmem:[#allocation5 + $0xd4] sm:$0xf0]  ;;  %v1689_v52 = vld [vmem:[#allocation5 + $0xd8] sm:$0xf0]  ;;  %v2597_v53 = vpack.c.bf16 %v122_v42, %v122_v42  ;;  %v2215_v54 = vld [vmem:[#allocation5 + $0x1cc] sm:$0xf] }
  0x38   :  { %515 = vmatpush.bf16.msra.mxu0 %v1600_v16  ;;  %v2217_v50 = vld [vmem:[#allocation5 + $0x1d4] sm:$0xf0]  ;;  %v1817_v55 = vld [vmem:[#allocation5 + $0x1d8] sm:$0xf0]  ;;  %v1688_v56 = vor.u32 %v2185_v46, %v1687_v45  ;;  %v1692_v58 = vor.u32 %v2183_v51, %v1689_v52  ;;  %v1671_v59 = vld [vmem:[#allocation5 + $0xa8] sm:$0xf] }
  0x39   :  { %528 = vmatpush.bf16.msra.mxu1 %v1728_v19  ;;  %v1816_v57 = vor.u32 %v2217_v50, %v1815_v47  ;;  %v2181_v60 = vld [vmem:[#allocation5 + $0xb4] sm:$0xf0]  ;;  %v1799_v61 = vld [vmem:[#allocation5 + $0x1a8] sm:$0xf]  ;;  %v1820_v62 = vor.u32 %v2215_v54, %v1817_v55  ;;  %v2179_v0 = vld [vmem:[#allocation5 + $0xac] sm:$0xf] }
  0x3a   :  { %541 = vmatpush.bf16.msra.mxu2 %v1604_v20  ;;  %v2213_v63 = vld [vmem:[#allocation5 + $0x1b4] sm:$0xf0]  ;;  %v1673_v1 = vld [vmem:[#allocation5 + $0xb8] sm:$0xf0]  ;;  %v2211_v2 = vld [vmem:[#allocation5 + $0x1ac] sm:$0xf]  ;;  %v1672_v4 = vor.u32 %v2181_v60, %v1671_v59 }
  0x3b   :  { %554 = vmatpush.bf16.msra.mxu3 %v1732_v24  ;;  %v1801_v3 = vld [vmem:[#allocation5 + $0x1b8] sm:$0xf0]  ;;  %v1800_v5 = vor.u32 %v2213_v63, %v1799_v61  ;;  %v1676_v6 = vor.u32 %v2179_v0, %v1673_v1  ;;  %v1655_v7 = vld [vmem:[#allocation5 + $0x88] sm:$0xf]  ;;  %v2177_v8 = vld [vmem:[#allocation5 + $0x94] sm:$0xf0] }
  0x3c   :  { %516 = vmatpush.bf16.msra.mxu0 %v1584_v31  ;;  %v1783_v9 = vld [vmem:[#allocation5 + $0x188] sm:$0xf]  ;;  %v1804_v10 = vor.u32 %v2211_v2, %v1801_v3  ;;  %v2209_v11 = vld [vmem:[#allocation5 + $0x194] sm:$0xf0]  ;;  %v2175_v12 = vld [vmem:[#allocation5 + $0x8c] sm:$0xf]  ;;  %v1656_v16 = vor.u32 %v2177_v8, %v1655_v7 }
  0x3d   :  { %529 = vmatpush.bf16.msra.mxu1 %v1712_v35  ;;  %v1657_v13 = vld [vmem:[#allocation5 + $0x98] sm:$0xf0]  ;;  %v2207_v14 = vld [vmem:[#allocation5 + $0x18c] sm:$0xf]  ;;  %v1639_v17 = vld [vmem:[#allocation5 + $0x68] sm:$0xf]  ;;  %v1784_v18 = vor.u32 %v2209_v11, %v1783_v9 }
  0x3e   :  { %542 = vmatpush.bf16.msra.mxu2 %v1588_v36  ;;  %v1785_v15 = vld [vmem:[#allocation5 + $0x198] sm:$0xf0]  ;;  %v1660_v19 = vor.u32 %v2175_v12, %v1657_v13  ;;  %v2173_v20 = vld [vmem:[#allocation5 + $0x74] sm:$0xf0]  ;;  %v1767_v21 = vld [vmem:[#allocation5 + $0x168] sm:$0xf] }
  0x3f   :  { %555 = vmatpush.bf16.msra.mxu3 %v1716_v40  ;;  %517 = vmatmul.bf16.vlgmr.msra.gmra.mxu0 %v2595_v49  ;;  %v2205_v22 = vld [vmem:[#allocation5 + $0x174] sm:$0xf0]  ;;  %v1788_v23 = vor.u32 %v2207_v14, %v1785_v15  ;;  %v2171_v24 = vld [vmem:[#allocation5 + $0x6c] sm:$0xf]  ;;  %v1641_v25 = vld [vmem:[#allocation5 + $0x78] sm:$0xf0]  ;;  %v1640_v28 = vor.u32 %v2173_v20, %v1639_v17 }
  0x40   :  { %561 = vmatpush.bf16.msrb.mxu0 %v1704_v41  ;;  %530 = vmatmul.bf16.vlgmr.msra.gmra.mxu1 %v2597_v53  ;;  %v2203_v26 = vld [vmem:[#allocation5 + $0x16c] sm:$0xf]  ;;  %v1769_v27 = vld [vmem:[#allocation5 + $0x178] sm:$0xf0]  ;;  %v1768_v29 = vor.u32 %v2205_v22, %v1767_v21  ;;  %v1644_v30 = vor.u32 %v2171_v24, %v1641_v25  ;;  %v1623_v31 = vld [vmem:[#allocation5 + $0x48] sm:$0xf] }
  0x41   :  { %574 = vmatpush.bf16.msrb.mxu1 %v1832_v43  ;;  %543 = vmatmul.bf16.vlgmr.msra.gmra.mxu2 %v2595_v49  ;;  %v2169_v32 = vld [vmem:[#allocation5 + $0x54] sm:$0xf0]  ;;  %v1751_v33 = vld [vmem:[#allocation5 + $0x148] sm:$0xf]  ;;  %v1772_v34 = vor.u32 %v2203_v26, %v1769_v27  ;;  %v2167_v36 = vld [vmem:[#allocation5 + $0x4c] sm:$0xf] }
  0x42   :  { %587 = vmatpush.bf16.msrb.mxu2 %v1708_v44  ;;  %556 = vmatmul.bf16.vlgmr.msra.gmra.mxu3 %v2597_v53  ;;  %v2201_v35 = vld [vmem:[#allocation5 + $0x154] sm:$0xf0]  ;;  %v1625_v37 = vld [vmem:[#allocation5 + $0x58] sm:$0xf0]  ;;  %v2199_v38 = vld [vmem:[#allocation5 + $0x14c] sm:$0xf]  ;;  %v1624_v40 = vor.u32 %v2169_v32, %v1623_v31 }
  0x43   :  { %600 = vmatpush.bf16.msrb.mxu3 %v1836_v48  ;;  %v1753_v39 = vld [vmem:[#allocation5 + $0x158] sm:$0xf0]  ;;  %v1752_v41 = vor.u32 %v2201_v35, %v1751_v33  ;;  %v1628_v42 = vor.u32 %v2167_v36, %v1625_v37  ;;  %v1607_v43 = vld [vmem:[#allocation5 + $0x28] sm:$0xf]  ;;  %v2165_v44 = vld [vmem:[#allocation5 + $0x34] sm:$0xf0] }
  0x44   :  { %562 = vmatpush.bf16.msrb.mxu0 %v1688_v56  ;;  %v1735_v45 = vld [vmem:[#allocation5 + $0x128] sm:$0xf]  ;;  %v1756_v46 = vor.u32 %v2199_v38, %v1753_v39  ;;  %v2197_v47 = vld [vmem:[#allocation5 + $0x134] sm:$0xf0]  ;;  %v2163_v48 = vld [vmem:[#allocation5 + $0x2c] sm:$0xf]  ;;  %v1608_v54 = vor.u32 %v2165_v44, %v1607_v43 }
  0x45   :  { %575 = vmatpush.bf16.msrb.mxu1 %v1816_v57  ;;  %v1609_v50 = vld [vmem:[#allocation5 + $0x38] sm:$0xf0]  ;;  %v2195_v51 = vld [vmem:[#allocation5 + $0x12c] sm:$0xf]  ;;  %v1736_v55 = vor.u32 %v2197_v47, %v1735_v45  ;;  %v1591_v57 = vld [vmem:[#allocation5 + $0x8] sm:$0xf] }
  0x46   :  { %588 = vmatpush.bf16.msrb.mxu2 %v1692_v58  ;;  %v1737_v52 = vld [vmem:[#allocation5 + $0x138] sm:$0xf0]  ;;  %v1612_v56 = vor.u32 %v2163_v48, %v1609_v50  ;;  %v2161_v58 = vld [vmem:[#allocation5 + $0x14] sm:$0xf0]  ;;  %v1719_v59 = vld [vmem:[#allocation5 + $0x108] sm:$0xf] }
  0x47   :  { %601 = vmatpush.bf16.msrb.mxu3 %v1820_v62  ;;  %v1740_v60 = vor.u32 %v2195_v51, %v1737_v52  ;;  %v2193_v61 = vld [vmem:[#allocation5 + $0x114] sm:$0xf0]  ;;  %v2159_v62 = vld [vmem:[#allocation5 + $0xc] sm:$0xf]  ;;  %v1593_v63 = vld [vmem:[#allocation5 + $0x18] sm:$0xf0]  ;;  %v1592_v2 = vor.u32 %v2161_v58, %v1591_v57 }
  0x48   :  { %563 = vmatpush.bf16.msrb.mxu0 %v1672_v4  ;;  %v2191_v0 = vld [vmem:[#allocation5 + $0x10c] sm:$0xf]  ;;  %v1721_v1 = vld [vmem:[#allocation5 + $0x118] sm:$0xf0]  ;;  %v1720_v3 = vor.u32 %v2193_v61, %v1719_v59  ;;  %v1596_v4 = vor.u32 %v2159_v62, %v1593_v63  ;;  %v1959_v57 = vld [vmem:[#allocation10 + $0xf0] sm:$0xf] }
  0x49   :  { %576 = vmatpush.bf16.msrb.mxu1 %v1800_v5  ;;  %v1724_v5 = vor.u32 %v2191_v0, %v1721_v1  ;;  %v2023_v61 = vld [vmem:[#allocation10 + $0x170] sm:$0xf]  ;;  %v2269_v62 = vld [vmem:[#allocation10 + $0x174] sm:$0xf0]  ;;  %vm749_vm12 = vcmask 1041408   ;;  %s2526_s22 = smov [#allocation13]  }
  0x4a   :  { %589 = vmatpush.bf16.msrb.mxu2 %v1676_v6  ;;  %v2525_v6 = vmov 8.0   ;;  %v2024_v0 = vor.u32 %v2269_v62, %v2023_v61  ;;  %v2087_v1 = vld [vmem:[#allocation10 + $0x1f0] sm:$0xf]  ;;  %s1568_s24 = sshll.u32 %s2803_s9, 4  ;;  %s1569_s24 = int_to_ptr.hbm [resolvable:$true] %s1568_s24 }
  0x4b   :  { %602 = vmatpush.bf16.msrb.mxu3 %v1804_v10  ;;  %2317 = vrcp.f32 %v2525_v6 }
  0x4c   :  { %564 = vmatpush.bf16.msrb.mxu0 %v1656_v16 }
  0x4d   :  { %577 = vmatpush.bf16.msrb.mxu1 %v1784_v18 }
  0x4e   :  { %590 = vmatpush.bf16.msrb.mxu2 %v1660_v19 }
  0x4f   :  { %603 = vmatpush.bf16.msrb.mxu3 %v1788_v23 }
  0x50   :  { %565 = vmatpush.bf16.msrb.mxu0 %v1640_v28 }
  0x51   :  { %578 = vmatpush.bf16.msrb.mxu1 %v1768_v29  ;;  %v2318_v7 = vpop.eup %2317 }
  0x52   :  { %591 = vmatpush.bf16.msrb.mxu2 %v1644_v30  ;;  %v640_v11 = vmul.f32 8.0, %v2318_v7  ;;  %vm644_vm0 = vweird.f32 %v2318_v7 }
  0x53   :  { %604 = vmatpush.bf16.msrb.mxu3 %v1772_v34 }
  0x54   :  { %566 = vmatpush.bf16.msrb.mxu0 %v1624_v40  ;;  %v641_v15 = vsub.f32 1.0, %v640_v11  ;;  %v1951_v11 = vld [vmem:[#allocation10 + $0xe0] sm:$0xf] }
  0x55   :  { %579 = vmatpush.bf16.msrb.mxu1 %v1752_v41 }
  0x56   :  { %592 = vmatpush.bf16.msrb.mxu2 %v1628_v42  ;;  %v642_v23 = vmul.f32 %v2318_v7, %v641_v15  ;;  %v2251_v15 = vld [vmem:[#allocation10 + $0xe4] sm:$0xf0] }
  0x57   :  { %605 = vmatpush.bf16.msrb.mxu3 %v1756_v46 }
  0x58   :  { %567 = vmatpush.bf16.msrb.mxu0 %v1608_v54  ;;  %v643_v31 = vadd.f32 %v2318_v7, %v642_v23 }
  0x59   :  { %580 = vmatpush.bf16.msrb.mxu1 %v1736_v55  ;;  %v1895_v55 = vld [vmem:[#allocation10 + $0x70] sm:$0xf] }
  0x5a   :  { %593 = vmatpush.bf16.msrb.mxu2 %v1612_v56  ;;  %v2619_v40 = vsel %vm644_vm0, %v2318_v7, %v643_v31  ;;  %v2237_v56 = vld [vmem:[#allocation10 + $0x74] sm:$0xf0] }
  0x5b   :  { %606 = vmatpush.bf16.msrb.mxu3 %v1740_v60  ;;  %v1896_v59 = vor.u32 %v2237_v56, %v1895_v55  ;;  %v2253_v60 = vld [vmem:[#allocation10 + $0xf4] sm:$0xf0]  ;;  %v1935_v55 = vld [vmem:[#allocation10 + $0xc0] sm:$0xf] }
  0x5c   :  { %568 = vmatpush.bf16.msrb.mxu0 %v1592_v2  ;;  %v1960_v63 = vor.u32 %v2253_v60, %v1959_v57  ;;  %v2285_v2 = vld [vmem:[#allocation10 + $0x1f4] sm:$0xf0] }
  0x5d   :  { %581 = vmatpush.bf16.msrb.mxu1 %v1720_v3  ;;  %v2088_v6 = vor.u32 %v2285_v2, %v2087_v1 }
  0x5e   :  { %594 = vmatpush.bf16.msrb.mxu2 %v1596_v4 }
  0x5f   :  { %607 = vmatpush.bf16.msrb.mxu3 %v1724_v5  ;;  %569 = vmatmul.bf16.vlgmr.msrb.gmra.mxu0 %v2595_v49 }
  0x60   :  { %582 = vmatmul.bf16.vlgmr.msrb.gmra.mxu1 %v2597_v53  ;;  %1187 = vmatpush.bf16.msra.mxu0 %v1896_v59  ;;  %v1999_v59 = vld [vmem:[#allocation10 + $0x140] sm:$0xf] }
  0x61   :  { %595 = vmatmul.bf16.vlgmr.msrb.gmra.mxu2 %v2595_v49  ;;  %1200 = vmatpush.bf16.msra.mxu1 %v1960_v63  ;;  %v2263_v63 = vld [vmem:[#allocation10 + $0x144] sm:$0xf0] }
  0x62   :  { %608 = vmatmul.bf16.vlgmr.msrb.gmra.mxu3 %v2597_v53  ;;  %1213 = vmatpush.bf16.msra.mxu2 %v2024_v0  ;;  %v2063_v0 = vld [vmem:[#allocation10 + $0x1c0] sm:$0xf] }
  0x63   :  { %1226 = vmatpush.bf16.msra.mxu3 %v2088_v6  ;;  %v1863_v6 = vld [vmem:[#allocation10 + $0x30] sm:$0xf] }
  0xbc   :  { %v518_v8 = vpop.f32.mrf.mxu0 }
  0xbd   :  { %v531_v9 = vpop.f32.mrf.mxu1 }
  0xbe   :  { %v2607_v10 = vadd.f32 %v531_v9, %v518_v8  ;;  %v1887_v8 = vld [vmem:[#allocation10 + $0x60] sm:$0xf]  ;;  %v2235_v9 = vld [vmem:[#allocation10 + $0x64] sm:$0xf0] }
  0xc0   :  { %v615_v12 = vrot.slane %v2607_v10, 4  ;;  %v650_v13 = vmul.f32 %v2607_v10, %v2607_v10 }
  0xc2   :  { %v616_v14 = vadd.f32 %v615_v12, %v2607_v10  ;;  %v654_v16 = vrot.slane %v650_v13, 4 }
  0xc4   :  { %v544_v49 = vpop.f32.mrf.mxu2  ;;  %v617_v17 = vrot.slane %v616_v14, 2  ;;  %v655_v53 = vadd.f32 %v654_v16, %v650_v13  ;;  %v520_v19 = vpop.f32.mrf.mxu0  ;;  %v2015_v16 = vld [vmem:[#allocation10 + $0x160] sm:$0xf] }
  0xc5   :  { %v557_v18 = vpop.f32.mrf.mxu3  ;;  %v533_v21 = vpop.f32.mrf.mxu1 }
  0xc6   :  { %v2613_v20 = vadd.f32 %v557_v18, %v544_v49  ;;  %v618_v22 = vadd.f32 %v617_v17, %v616_v14  ;;  %v656_v24 = vrot.slane %v655_v53, 2  ;;  %v1888_v14 = vor.u32 %v2235_v9, %v1887_v8  ;;  %v2267_v17 = vld [vmem:[#allocation10 + $0x164] sm:$0xf0] }
  0xc7   :  { %v1952_v49 = vor.u32 %v2251_v15, %v1951_v11  ;;  %v2283_v18 = vld [vmem:[#allocation10 + $0x1e4] sm:$0xf0]  ;;  %v2016_v23 = vor.u32 %v2267_v17, %v2015_v16  ;;  %v2229_v11 = vld [vmem:[#allocation10 + $0x34] sm:$0xf0] }
  0xc8   :  { %v621_v25 = vrot.slane %v2613_v20, 4  ;;  %v651_v26 = vmul.f32 %v2613_v20, %v2613_v20  ;;  %v619_v27 = vrot.slane %v618_v22, 1  ;;  %v657_v28 = vadd.f32 %v656_v24, %v655_v53  ;;  %v2079_v53 = vld [vmem:[#allocation10 + $0x1e0] sm:$0xf]  ;;  %1188 = vmatpush.bf16.msra.mxu0 %v1888_v14  ;;  %v1927_v14 = vld [vmem:[#allocation10 + $0xb0] sm:$0xf] }
  0xc9   :  { %1201 = vmatpush.bf16.msra.mxu1 %v1952_v49  ;;  %v2080_v24 = vor.u32 %v2283_v18, %v2079_v53  ;;  %1214 = vmatpush.bf16.msra.mxu2 %v2016_v23  ;;  %v1864_v17 = vor.u32 %v2229_v11, %v1863_v6  ;;  %v2245_v53 = vld [vmem:[#allocation10 + $0xb4] sm:$0xf0]  ;;  %v1991_v18 = vld [vmem:[#allocation10 + $0x130] sm:$0xf] }
  0xca   :  { %v622_v29 = vadd.f32 %v621_v25, %v2613_v20  ;;  %v660_v30 = vrot.slane %v651_v26, 4  ;;  %v620_v36 = vadd.f32 %v619_v27, %v618_v22  ;;  %v658_v37 = vrot.slane %v657_v28, 1  ;;  %v1879_v25 = vld [vmem:[#allocation10 + $0x50] sm:$0xf]  ;;  %v2257_v6 = vld [vmem:[#allocation10 + $0x114] sm:$0xf0] }
  0xcb   :  { %1227 = vmatpush.bf16.msra.mxu3 %v2080_v24  ;;  %v1928_v24 = vor.u32 %v2245_v53, %v1927_v14  ;;  %v2039_v14 = vld [vmem:[#allocation10 + $0x190] sm:$0xf]  ;;  %v1839_v53 = vld [vmem:[#allocation10] sm:$0xf] }
  0xcc   :  { %v623_v32 = vrot.slane %v622_v29, 2  ;;  %v661_v33 = vadd.f32 %v660_v30, %v651_v26  ;;  %v546_v34 = vpop.f32.mrf.mxu2  ;;  %v2622_v43 = vmul.f32 %v2619_v40, %v620_v36  ;;  %v659_v44 = vadd.f32 %v658_v37, %v657_v28  ;;  %v2233_v26 = vld [vmem:[#allocation10 + $0x54] sm:$0xf0]  ;;  %v1943_v28 = vld [vmem:[#allocation10 + $0xd0] sm:$0xf] }
  0xcd   :  { %v559_v35 = vpop.f32.mrf.mxu3  ;;  %v1880_v27 = vor.u32 %v2233_v26, %v1879_v25  ;;  %v2007_v30 = vld [vmem:[#allocation10 + $0x150] sm:$0xf]  ;;  %v2261_v25 = vld [vmem:[#allocation10 + $0x134] sm:$0xf0] }
  0xce   :  { %v624_v38 = vadd.f32 %v623_v32, %v622_v29  ;;  %v662_v39 = vrot.slane %v661_v33, 2  ;;  %v678_v50 = vmul.f32 %v659_v44, %v2619_v40  ;;  %v682_v51 = vmul.f32 %v2622_v43, %v2622_v43  ;;  %v2249_v29 = vld [vmem:[#allocation10 + $0xd4] sm:$0xf0]  ;;  %v2071_v36 = vld [vmem:[#allocation10 + $0x1d0] sm:$0xf] }
  0xcf   :  { %v1944_v34 = vor.u32 %v2249_v29, %v1943_v28  ;;  %v2265_v35 = vld [vmem:[#allocation10 + $0x154] sm:$0xf0]  ;;  %1189 = vmatpush.bf16.msra.mxu0 %v1880_v27  ;;  %v2055_v26 = vld [vmem:[#allocation10 + $0x1b0] sm:$0xf]  ;;  %v1992_v29 = vor.u32 %v2261_v25, %v1991_v18  ;;  %v2223_v18 = vld [vmem:[#allocation10 + $0x4] sm:$0xf0] }
  0xd0   :  { %v625_v41 = vrot.slane %v624_v38, 1  ;;  %v663_v42 = vadd.f32 %v662_v39, %v661_v33  ;;  %v686_v3 = vsub.f32 %v678_v50, %v682_v51  ;;  %v2008_v39 = vor.u32 %v2265_v35, %v2007_v30  ;;  %v1871_v50 = vld [vmem:[#allocation10 + $0x40] sm:$0xf]  ;;  %v2231_v51 = vld [vmem:[#allocation10 + $0x44] sm:$0xf0] }
  0xd1   :  { %1202 = vmatpush.bf16.msra.mxu1 %v1944_v34  ;;  %v2277_v30 = vld [vmem:[#allocation10 + $0x1b4] sm:$0xf0]  ;;  %v2227_v35 = vld [vmem:[#allocation10 + $0x24] sm:$0xf0]  ;;  %v1967_v25 = vld [vmem:[#allocation10 + $0x100] sm:$0xf] }
  0xd2   :  { %v626_v45 = vadd.f32 %v625_v41, %v624_v38  ;;  %v664_v46 = vrot.slane %v663_v42, 1  ;;  %v690_v19 = vmax.f32 %v686_v3, 0.0  ;;  %v2281_v41 = vld [vmem:[#allocation10 + $0x1d4] sm:$0xf0]  ;;  %1215 = vmatpush.bf16.msra.mxu2 %v2008_v39  ;;  %v2056_v34 = vor.u32 %v2277_v30, %v2055_v26  ;;  %v2271_v30 = vld [vmem:[#allocation10 + $0x184] sm:$0xf0] }
  0xd4   :  { %v2625_v47 = vmul.f32 %v2619_v40, %v626_v45  ;;  %v665_v48 = vadd.f32 %v664_v46, %v663_v42 }
  0xd6   :  { %v679_v52 = vmul.f32 %v665_v48, %v2619_v40  ;;  %v683_v54 = vmul.f32 %v2625_v47, %v2625_v47  ;;  %v2072_v48 = vor.u32 %v2281_v41, %v2071_v36  ;;  %v1919_v36 = vld [vmem:[#allocation10 + $0xa0] sm:$0xf]  ;;  %v2243_v41 = vld [vmem:[#allocation10 + $0xa4] sm:$0xf0] }
  0xd8   :  { %v687_v58 = vsub.f32 %v679_v52, %v683_v54  ;;  %v2644_v52 = vadd.f32 1e-05, %v690_v19  ;;  %v1872_v54 = vor.u32 %v2231_v51, %v1871_v50  ;;  %1228 = vmatpush.bf16.msra.mxu3 %v2072_v48  ;;  %v1920_v51 = vor.u32 %v2243_v41, %v1919_v36  ;;  %v2252_v36 = vld [vmem:[#allocation10 + $0xf4] sm:$0xf] }
  0xd9   :  { %v2268_v41 = vld [vmem:[#allocation10 + $0x174] sm:$0xf] }
  0xda   :  { %v691_v4 = vmax.f32 %v687_v58, 0.0  ;;  %v2247_v58 = vld [vmem:[#allocation10 + $0xc4] sm:$0xf0]  ;;  %1190 = vmatpush.bf16.msra.mxu0 %v1872_v54  ;;  %v2047_v54 = vld [vmem:[#allocation10 + $0x1a0] sm:$0xf]  ;;  %vm704_vm13 = vweird.f32 %v2644_v52 }
  0xdb   :  { %v1936_v62 = vor.u32 %v2247_v58, %v1935_v55  ;;  %v2275_v55 = vld [vmem:[#allocation10 + $0x1a4] sm:$0xf0] }
  0xdc   :  { %v570_v5 = vpop.f32.mrf.mxu0  ;;  %v2633_v12 = vadd.f32 1e-05, %v691_v4  ;;  %v2000_v4 = vor.u32 %v2263_v63, %v1999_v59  ;;  %v2048_v58 = vor.u32 %v2275_v55, %v2047_v54  ;;  %v1847_v59 = vld [vmem:[#allocation10 + $0x10] sm:$0xf]  ;;  %v2089_v54 = vld [vmem:[#allocation10 + $0x1f8] sm:$0xf0] }
  0xdd   :  { %v583_v7 = vpop.f32.mrf.mxu1  ;;  %1203 = vmatpush.bf16.msra.mxu1 %v1936_v62 }
  0xde   :  { %v2635_v13 = vadd.f32 %v583_v7, %v570_v5  ;;  %2319 = vrsqrt.f32 %v2633_v12  ;;  %v2279_v5 = vld [vmem:[#allocation10 + $0x1c4] sm:$0xf0]  ;;  %1216 = vmatpush.bf16.msra.mxu2 %v2000_v4  ;;  %1191 = vmatpush.bf16.msra.mxu0 %v1864_v17  ;;  %vm714_vm1 = vweird.f32 %v2633_v12 }
  0xdf   :  { %v2064_v9 = vor.u32 %v2279_v5, %v2063_v0  ;;  %2321 = vrsqrt.f32 %v2644_v52  ;;  %v2241_v0 = vld [vmem:[#allocation10 + $0x94] sm:$0xf0]  ;;  %v1975_v5 = vld [vmem:[#allocation10 + $0x110] sm:$0xf] }
  0xe0   :  { %v627_v21 = vrot.slane %v2635_v13, 4  ;;  %v652_v22 = vmul.f32 %v2635_v13, %v2635_v13  ;;  %v1976_v11 = vor.u32 %v2257_v6, %v1975_v5 }
  0xe1   :  { %1229 = vmatpush.bf16.msra.mxu3 %v2064_v9  ;;  %1204 = vmatpush.bf16.msra.mxu1 %v1928_v24  ;;  %v2239_v24 = vld [vmem:[#allocation10 + $0x84] sm:$0xf0] }
  0xe2   :  { %v628_v31 = vadd.f32 %v627_v21, %v2635_v13  ;;  %v666_v32 = vrot.slane %v652_v22, 4  ;;  %1217 = vmatpush.bf16.msra.mxu2 %v1992_v29  ;;  %v2031_v29 = vld [vmem:[#allocation10 + $0x180] sm:$0xf] }
  0xe4   :  { %v596_v33 = vpop.f32.mrf.mxu2  ;;  %v572_v38 = vpop.f32.mrf.mxu0  ;;  %v629_v42 = vrot.slane %v628_v31, 2  ;;  %v667_v44 = vadd.f32 %v666_v32, %v652_v22 }
  0xe5   :  { %v609_v37 = vpop.f32.mrf.mxu3  ;;  %v585_v46 = vpop.f32.mrf.mxu1  ;;  %1230 = vmatpush.bf16.msra.mxu3 %v2056_v34  ;;  %1205 = vmatpush.bf16.msra.mxu1 %v1920_v51  ;;  %v2236_v34 = vld [vmem:[#allocation10 + $0x74] sm:$0xf] }
  0xe6   :  { %v2642_v45 = vadd.f32 %v609_v37, %v596_v33  ;;  %v630_v56 = vadd.f32 %v629_v42, %v628_v31  ;;  %v668_v57 = vrot.slane %v667_v44, 2  ;;  %v2649_v1 = vpop.eup %2319  ;;  %v1855_v31 = vld [vmem:[#allocation10 + $0x20] sm:$0xf]  ;;  %v2284_v51 = vld [vmem:[#allocation10 + $0x1f4] sm:$0xf] }
  0xe7   :  { %v709_v19 = vmul.f32 %v2649_v1, %v2633_v12  ;;  %v1856_v39 = vor.u32 %v2227_v35, %v1855_v31  ;;  %v1983_v42 = vld [vmem:[#allocation10 + $0x120] sm:$0xf]  ;;  %v1897_v35 = vld [vmem:[#allocation10 + $0x78] sm:$0xf0]  ;;  %v2092_v55 = vor.u32 %v2284_v51, %v2089_v54  ;;  %vm715_vm2 = vweird.f32 %v2649_v1 }
  0xe8   :  { %v633_v60 = vrot.slane %v2642_v45, 4  ;;  %v653_v61 = vmul.f32 %v2642_v45, %v2642_v45  ;;  %v631_v2 = vrot.slane %v630_v56, 1  ;;  %v669_v3 = vadd.f32 %v668_v57, %v667_v44  ;;  %v2259_v44 = vld [vmem:[#allocation10 + $0x124] sm:$0xf0]  ;;  %vm2694_vm3 = vmor %vm714_vm1, %vm715_vm2 }
  0xe9   :  { %v710_v46 = vmul.f32 %v2649_v1, %v709_v19  ;;  %1192 = vmatpush.bf16.msra.mxu0 %v1856_v39  ;;  %v1984_v57 = vor.u32 %v2259_v44, %v1983_v42  ;;  %1231 = vmatpush.bf16.msra.mxu3 %v2048_v58  ;;  %v1961_v39 = vld [vmem:[#allocation10 + $0xf8] sm:$0xf0]  ;;  %v2250_v58 = vld [vmem:[#allocation10 + $0xe4] sm:$0xf] }
  0xea   :  { %v634_v7 = vadd.f32 %v633_v60, %v2642_v45  ;;  %v672_v8 = vrot.slane %v653_v61, 4  ;;  %v632_v15 = vadd.f32 %v631_v2, %v630_v56  ;;  %v670_v16 = vrot.slane %v669_v3, 1  ;;  %v2225_v60 = vld [vmem:[#allocation10 + $0x14] sm:$0xf0]  ;;  %v2025_v42 = vld [vmem:[#allocation10 + $0x178] sm:$0xf0] }
  0xeb   :  { %1218 = vmatpush.bf16.msra.mxu2 %v1984_v57  ;;  %v1889_v57 = vld [vmem:[#allocation10 + $0x68] sm:$0xf0] }
  0xec   :  { %v598_v49 = vpop.f32.mrf.mxu2  ;;  %v635_v21 = vrot.slane %v634_v7, 2  ;;  %v673_v22 = vadd.f32 %v672_v8, %v653_v61  ;;  %v2655_v27 = vmul.f32 %v2619_v40, %v632_v15  ;;  %v671_v28 = vadd.f32 %v670_v16, %v669_v3  ;;  %v1911_v61 = vld [vmem:[#allocation10 + $0x90] sm:$0xf]  ;;  %v2273_v15 = vld [vmem:[#allocation10 + $0x194] sm:$0xf0]  ;;  %v2667_v16 = vpop.eup %2321 }
  0xed   :  { %v611_v23 = vpop.f32.mrf.mxu3  ;;  %v1848_v3 = vor.u32 %v2225_v60, %v1847_v59  ;;  %v1912_v4 = vor.u32 %v2241_v0, %v1911_v61  ;;  %v2040_v17 = vor.u32 %v2273_v15, %v2039_v14  ;;  %v1953_v61 = vld [vmem:[#allocation10 + $0xe8] sm:$0xf0]  ;;  %vm705_vm14 = vweird.f32 %v2667_v16 }
  0xee   :  { %v636_v32 = vadd.f32 %v635_v21, %v634_v7  ;;  %v674_v33 = vrot.slane %v673_v22, 2  ;;  %v680_v37 = vmul.f32 %v671_v28, %v2619_v40  ;;  %v684_v38 = vmul.f32 %v2655_v27, %v2655_v27  ;;  %v1903_v23 = vld [vmem:[#allocation10 + $0x80] sm:$0xf]  ;;  %v2255_v28 = vld [vmem:[#allocation10 + $0x104] sm:$0xf0]  ;;  %vm2735_vm15 = vmor %vm704_vm13, %vm705_vm14 }
  0xef   :  { %v2662_v7 = vmul.f32 0.5, %v710_v46  ;;  %1193 = vmatpush.bf16.msra.mxu0 %v1848_v3  ;;  %1206 = vmatpush.bf16.msra.mxu1 %v1912_v4  ;;  %v1904_v26 = vor.u32 %v2239_v24, %v1903_v23  ;;  %v1956_v0 = vor.u32 %v2250_v58, %v1953_v61  ;;  %v2282_v3 = vld [vmem:[#allocation10 + $0x1e4] sm:$0xf]  ;;  %v2081_v4 = vld [vmem:[#allocation10 + $0x1e8] sm:$0xf0] }
  0xf0   :  { %v637_v48 = vrot.slane %v636_v32, 1  ;;  %v675_v50 = vadd.f32 %v674_v33, %v673_v22  ;;  %v688_v56 = vsub.f32 %v680_v37, %v684_v38  ;;  %v1840_v22 = vor.u32 %v2223_v18, %v1839_v53  ;;  %1219 = vmatpush.bf16.msra.mxu2 %v1976_v11  ;;  %1232 = vmatpush.bf16.msra.mxu3 %v2040_v17  ;;  %v2248_v11 = vld [vmem:[#allocation10 + $0xd4] sm:$0xf]  ;;  %v1945_v53 = vld [vmem:[#allocation10 + $0xd8] sm:$0xf0] }
  0xf1   :  { %v2032_v33 = vor.u32 %v2271_v30, %v2031_v29  ;;  %v699_v37 = vmul.f32 %v2667_v16, %v2644_v52  ;;  %v1900_v38 = vor.u32 %v2236_v34, %v1897_v35  ;;  %v712_v44 = vsub.f32 1.5, %v2662_v7  ;;  %v2232_v7 = vld [vmem:[#allocation10 + $0x54] sm:$0xf]  ;;  %v2073_v24 = vld [vmem:[#allocation10 + $0x1d8] sm:$0xf0] }
  0xf2   :  { %v638_v62 = vadd.f32 %v637_v48, %v636_v32  ;;  %v676_v63 = vrot.slane %v675_v50, 1  ;;  %v692_v2 = vmax.f32 %v688_v56, 0.0  ;;  %v1968_v32 = vor.u32 %v2255_v28, %v1967_v25  ;;  %v2234_v56 = vld [vmem:[#allocation10 + $0x64] sm:$0xf]  ;;  %v2264_v18 = vld [vmem:[#allocation10 + $0x154] sm:$0xf] }
  0xf3   :  { %1194 = vmatpush.bf16.msra.mxu0 %v1840_v22  ;;  %1207 = vmatpush.bf16.msra.mxu1 %v1904_v26  ;;  %v1964_v48 = vor.u32 %v2252_v36, %v1961_v39  ;;  %v1892_v60 = vor.u32 %v2234_v56, %v1889_v57  ;;  %v700_v5 = vmul.f32 %v2667_v16, %v699_v37  ;;  %v2009_v22 = vld [vmem:[#allocation10 + $0x158] sm:$0xf0]  ;;  %v2280_v23 = vld [vmem:[#allocation10 + $0x1d4] sm:$0xf]  ;;  %v2230_v28 = vld [vmem:[#allocation10 + $0x44] sm:$0xf] }
  0xf4   :  { %v2665_v8 = vmul.f32 %v2619_v40, %v638_v62  ;;  %v677_v9 = vadd.f32 %v676_v63, %v675_v50  ;;  %v2669_v49 = vadd.f32 1e-05, %v692_v2  ;;  %v2028_v50 = vor.u32 %v2268_v41, %v2025_v42  ;;  %1220 = vmatpush.bf16.msra.mxu2 %v1968_v32  ;;  %1233 = vmatpush.bf16.msra.mxu3 %v2032_v33  ;;  %v2266_v62 = vld [vmem:[#allocation10 + $0x164] sm:$0xf]  ;;  %v2017_v2 = vld [vmem:[#allocation10 + $0x168] sm:$0xf0] }
  0xf5   :  { %v2020_v14 = vor.u32 %v2266_v62, %v2017_v2  ;;  %v2084_v15 = vor.u32 %v2282_v3, %v2081_v4  ;;  %v2012_v25 = vor.u32 %v2264_v18, %v2009_v22  ;;  %v2076_v26 = vor.u32 %v2280_v23, %v2073_v24  ;;  %v1873_v29 = vld [vmem:[#allocation10 + $0x48] sm:$0xf0]  ;;  %v2246_v30 = vld [vmem:[#allocation10 + $0xc4] sm:$0xf]  ;;  %v2228_v56 = vld [vmem:[#allocation10 + $0x34] sm:$0xf] }
  0xf6   :  { %v681_v19 = vmul.f32 %v677_v9, %v2619_v40  ;;  %v685_v21 = vmul.f32 %v2665_v8, %v2665_v8  ;;  %2323 = vrsqrt.f32 %v2669_v49  ;;  %v1881_v9 = vld [vmem:[#allocation10 + $0x58] sm:$0xf0]  ;;  %v713_v32 = vmul.f32 %v2649_v1, %v712_v44  ;;  %v1937_v34 = vld [vmem:[#allocation10 + $0xc8] sm:$0xf0]  ;;  %v2262_v35 = vld [vmem:[#allocation10 + $0x144] sm:$0xf] }
  0xf7   :  { %1239 = vmatpush.bf16.msrb.mxu0 %v1900_v38  ;;  %1252 = vmatpush.bf16.msrb.mxu1 %v1964_v48  ;;  %v1884_v17 = vor.u32 %v2232_v7, %v1881_v9  ;;  %v1876_v36 = vor.u32 %v2230_v28, %v1873_v29  ;;  %v2001_v37 = vld [vmem:[#allocation10 + $0x148] sm:$0xf0]  ;;  %v2278_v38 = vld [vmem:[#allocation10 + $0x1c4] sm:$0xf]  ;;  %v1940_v42 = vor.u32 %v2246_v30, %v1937_v34  ;;  %vm724_vm7 = vweird.f32 %v2669_v49  ;;  %v1865_v57 = vld [vmem:[#allocation10 + $0x38] sm:$0xf0] }
  0xf8   :  { %v689_v31 = vsub.f32 %v681_v19, %v685_v21  ;;  %1265 = vmatpush.bf16.msrb.mxu2 %v2028_v50  ;;  %1278 = vmatpush.bf16.msrb.mxu3 %v2092_v55  ;;  %v1948_v21 = vor.u32 %v2248_v11, %v1945_v53  ;;  %v2065_v39 = vld [vmem:[#allocation10 + $0x1c8] sm:$0xf0]  ;;  %v2004_v50 = vor.u32 %v2262_v35, %v2001_v37  ;;  %v2244_v58 = vld [vmem:[#allocation10 + $0xb4] sm:$0xf]  ;;  %v1929_v2 = vld [vmem:[#allocation10 + $0xb8] sm:$0xf0] }
  0xf9   :  { %v2068_v51 = vor.u32 %v2278_v38, %v2065_v39  ;;  %v717_v54 = vsel %vm2694_vm3, %v2649_v1, %v713_v32  ;;  %v1932_v3 = vor.u32 %v2244_v58, %v1929_v2  ;;  %v1993_v4 = vld [vmem:[#allocation10 + $0x138] sm:$0xf0]  ;;  %v2242_v18 = vld [vmem:[#allocation10 + $0xa4] sm:$0xf]  ;;  %v2049_v28 = vld [vmem:[#allocation10 + $0x1a8] sm:$0xf0] }
  0xfa   :  { %v693_v46 = vmax.f32 %v689_v31, 0.0  ;;  %v701_v31 = vmul.f32 0.5, %v700_v5  ;;  %v2712_v62 = vrot.slane %v717_v54, 7  ;;  %v2276_v5 = vld [vmem:[#allocation10 + $0x1b4] sm:$0xf] }
  0xfb   :  { %1240 = vmatpush.bf16.msrb.mxu0 %v1892_v60  ;;  %1253 = vmatpush.bf16.msrb.mxu1 %v1956_v0  ;;  %v1868_v0 = vor.u32 %v2228_v56, %v1865_v57  ;;  %v1849_v32 = vld [vmem:[#allocation10 + $0x18] sm:$0xf0]  ;;  %v613_v34 = vld [vmem:[#allocation7] sm:$0xf]  ;;  %v2256_v37 = vld [vmem:[#allocation10 + $0x114] sm:$0xf] }
  0xfc   :  { %v2678_v59 = vadd.f32 1e-05, %v693_v46  ;;  %v2680_v63 = vpop.eup %2323  ;;  %1266 = vmatpush.bf16.msrb.mxu2 %v2020_v14  ;;  %1279 = vmatpush.bf16.msrb.mxu3 %v2084_v15  ;;  %v702_v55 = vsub.f32 1.5, %v701_v31  ;;  %v2226_v15 = vld [vmem:[#allocation10 + $0x24] sm:$0xf] }
  0xfd   :  { %v719_v6 = vmul.f32 %v2680_v63, %v2669_v49  ;;  %vm725_vm4 = vweird.f32 %v2680_v63  ;;  %v2260_v49 = vld [vmem:[#allocation10 + $0x134] sm:$0xf]  ;;  %v1977_v38 = vld [vmem:[#allocation10 + $0x118] sm:$0xf0]  ;;  %v1841_v52 = vld [vmem:[#allocation10 + $0x8] sm:$0xf0] }
  0xfe   :  { %2325 = vrsqrt.f32 %v2678_v59  ;;  %vm2708_vm9 = vmor %vm724_vm7, %vm725_vm4  ;;  %vm734_vm10 = vweird.f32 %v2678_v59  ;;  %v1996_v11 = vor.u32 %v2260_v49, %v1993_v4  ;;  %v2224_v31 = vld [vmem:[#allocation10 + $0x14] sm:$0xf]  ;;  %v1905_v58 = vld [vmem:[#allocation10 + $0x88] sm:$0xf0] }
  0xff   :  { %v720_v19 = vmul.f32 %v2680_v63, %v719_v6  ;;  %1241 = vmatpush.bf16.msrb.mxu0 %v1884_v17  ;;  %1254 = vmatpush.bf16.msrb.mxu1 %v1948_v21  ;;  %v2057_v6 = vld [vmem:[#allocation10 + $0x1b8] sm:$0xf0]  ;;  %v1857_v17 = vld [vmem:[#allocation10 + $0x28] sm:$0xf0]  ;;  %v2258_v21 = vld [vmem:[#allocation10 + $0x124] sm:$0xf] }
 0x100   :  { %1267 = vmatpush.bf16.msrb.mxu2 %v2012_v25  ;;  %1280 = vmatpush.bf16.msrb.mxu3 %v2076_v26  ;;  %v2060_v14 = vor.u32 %v2276_v5, %v2057_v6  ;;  %v1860_v53 = vor.u32 %v2226_v15, %v1857_v17  ;;  %v1985_v25 = vld [vmem:[#allocation10 + $0x128] sm:$0xf0]  ;;  %v2274_v26 = vld [vmem:[#allocation10 + $0x1a4] sm:$0xf] }
 0x101   :  { %v721_v33 = vmul.f32 0.5, %v720_v19  ;;  %v1921_v19 = vld [vmem:[#allocation10 + $0xa8] sm:$0xf0]  ;;  %v1988_v29 = vor.u32 %v2258_v21, %v1985_v25  ;;  %v2052_v30 = vor.u32 %v2274_v26, %v2049_v28  ;;  %v614_v21 = vld [vmem:[#allocation8] sm:$0xf] }
 0x102   :  { %v1924_v24 = vor.u32 %v2242_v18, %v1921_v19  ;;  %v1969_v61 = vld [vmem:[#allocation10 + $0x108] sm:$0xf0] }
 0x103   :  { %v722_v44 = vsub.f32 1.5, %v721_v33  ;;  %1242 = vmatpush.bf16.msrb.mxu0 %v1876_v36  ;;  %1255 = vmatpush.bf16.msrb.mxu1 %v1940_v42  ;;  %v2240_v33 = vld [vmem:[#allocation10 + $0x94] sm:$0xf]  ;;  %v1913_v36 = vld [vmem:[#allocation10 + $0x98] sm:$0xf0] }
 0x104   :  { %v2690_v41 = vpop.eup %2325  ;;  %1268 = vmatpush.bf16.msrb.mxu2 %v2004_v50  ;;  %1281 = vmatpush.bf16.msrb.mxu3 %v2068_v51  ;;  %v2041_v50 = vld [vmem:[#allocation10 + $0x198] sm:$0xf0]  ;;  %v1980_v51 = vor.u32 %v2256_v37, %v1977_v38  ;;  %v2033_v2 = vld [vmem:[#allocation10 + $0x188] sm:$0xf0] }
 0x105   :  { %v729_v48 = vmul.f32 %v2690_v41, %v2678_v59  ;;  %vm735_vm8 = vweird.f32 %v2690_v41  ;;  %v723_v60 = vmul.f32 %v2680_v63, %v722_v44  ;;  %v703_v59 = vmul.f32 %v2667_v16, %v702_v55  ;;  %v2222_v55 = vld [vmem:[#allocation10 + $0x4] sm:$0xf] }
 0x106   :  { %vm2717_vm11 = vmor %vm734_vm10, %vm735_vm8  ;;  %v1916_v44 = vor.u32 %v2240_v33, %v1913_v36 }
 0x107   :  { %v730_v12 = vmul.f32 %v2690_v41, %v729_v48  ;;  %1243 = vmatpush.bf16.msrb.mxu0 %v1868_v0  ;;  %1256 = vmatpush.bf16.msrb.mxu1 %v1932_v3  ;;  %v727_v22 = vsel %vm2708_vm9, %v2680_v63, %v723_v60  ;;  %v1852_v63 = vor.u32 %v2224_v31, %v1849_v32  ;;  %v2272_v48 = vld [vmem:[#allocation10 + $0x194] sm:$0xf]  ;;  %v2254_v60 = vld [vmem:[#allocation10 + $0x104] sm:$0xf] }
 0x108   :  { %1269 = vmatpush.bf16.msrb.mxu2 %v1996_v11  ;;  %1282 = vmatpush.bf16.msrb.mxu3 %v2060_v14  ;;  %v743_v42 = vrot.slane %v727_v22, 6  ;;  %v2044_v54 = vor.u32 %v2272_v48, %v2041_v50  ;;  %v1844_v0 = vor.u32 %v2222_v55, %v1841_v52  ;;  %v1972_v4 = vor.u32 %v2254_v60, %v1969_v61 }
 0x109   :  { %v731_v1 = vmul.f32 0.5, %v730_v12  ;;  %v2238_v12 = vld [vmem:[#allocation10 + $0x84] sm:$0xf] }
 0x10a   :  { %v1908_v3 = vor.u32 %v2238_v12, %v1905_v58 }
 0x10b   :  { %v732_v7 = vsub.f32 1.5, %v731_v1  ;;  %1244 = vmatpush.bf16.msrb.mxu0 %v1860_v53  ;;  %1257 = vmatpush.bf16.msrb.mxu1 %v1924_v24 }
 0x10c   :  { %1270 = vmatpush.bf16.msrb.mxu2 %v1988_v29  ;;  %1283 = vmatpush.bf16.msrb.mxu3 %v2052_v30 }
 0x10d   :  { %v733_v23 = vmul.f32 %v2690_v41, %v732_v7 }
 0x10f   :  { %v737_v35 = vsel %vm2717_vm11, %v2690_v41, %v733_v23  ;;  %v707_v41 = vsel %vm2735_vm15, %v2667_v16, %v703_v59  ;;  %1245 = vmatpush.bf16.msrb.mxu0 %v1852_v63  ;;  %v2270_v16 = vld [vmem:[#allocation10 + $0x184] sm:$0xf]  ;;  %1258 = vmatpush.bf16.msrb.mxu1 %v1916_v44 }
 0x110   :  { %v744_v46 = vrot.slane %v737_v35, 5  ;;  %v746_v56 = vsel %vm745_vm5, %v707_v41, %v2712_v62  ;;  %1271 = vmatpush.bf16.msrb.mxu2 %v1980_v51  ;;  %1284 = vmatpush.bf16.msrb.mxu3 %v2044_v54  ;;  %v2036_v7 = vor.u32 %v2270_v16, %v2033_v2 }
 0x112   :  { %v748_v57 = vsel %vm747_vm6, %v743_v42, %v744_v46 }
 0x113   :  { %v750_v1 = vsel %vm749_vm12, %v746_v56, %v748_v57  ;;  %1246 = vmatpush.bf16.msrb.mxu0 %v1844_v0  ;;  %1259 = vmatpush.bf16.msrb.mxu1 %v1908_v3 }
 0x114   :  { %v752_v49 = vmul.f32 %v750_v1, %v613_v34  ;;  %1272 = vmatpush.bf16.msrb.mxu2 %v1972_v4  ;;  %1285 = vmatpush.bf16.msrb.mxu3 %v2036_v7 }
 0x116   :  { %v756_v5 = vperm.slane %v752_v49, 2  ;;  %v757_v6 = vperm.slane %v752_v49, 3  ;;  %v755_v62 = vperm.slane %v752_v49, 1  ;;  %v754_v9 = vperm.slane %v752_v49, 0 }
 0x118   :  { %v764_v11 = vmul.f32 %v756_v5, %v2655_v27  ;;  %v765_v14 = vmul.f32 %v757_v6, %v2665_v8  ;;  %v763_v15 = vmul.f32 %v755_v62, %v2625_v47  ;;  %v762_v53 = vmul.f32 %v754_v9, %v2622_v43 }
 0x119   :  { %v781_v8 = vmul.f32 %v757_v6, %v2642_v45  ;;  %v778_v24 = vmul.f32 %v754_v9, %v2607_v10  ;;  %v779_v47 = vmul.f32 %v755_v62, %v2613_v20  ;;  %v780_v25 = vmul.f32 %v756_v5, %v2635_v13 }
 0x11a   :  { %v771_v17 = vrot.slane %v764_v11, 6  ;;  %v772_v59 = vrot.slane %v765_v14, 5  ;;  %v770_v18 = vrot.slane %v763_v15, 7  ;;  %v2293_v15 = vld [vmem:[#allocation11 + $0x38] sm:$0xff] }
 0x11c   :  { %v774_v19 = vsel %vm747_vm6, %v771_v17, %v772_v59  ;;  %v773_v22 = vsel %vm745_vm5, %v762_v53, %v770_v18  ;;  %v2301_v17 = vld [vmem:[#allocation11 + $0x78] sm:$0xff] }
 0x11d   :  { %v775_v23 = vsel %vm749_vm12, %v773_v22, %v774_v19 }
 0x11e   :  { %v777_v27 = vsub.f32 %v614_v21, %v775_v23  ;;  %v2292_v23 = vld [vmem:[#allocation11 + $0x30] sm:$0xff] }
 0x120   :  { %v783_v26 = vperm.slane %v777_v27, 0  ;;  %v784_v28 = vperm.slane %v777_v27, 1  ;;  %v785_v43 = vperm.slane %v777_v27, 2  ;;  %v786_v29 = vperm.slane %v777_v27, 3  ;;  %v2300_v27 = vld [vmem:[#allocation11 + $0x70] sm:$0xff] }
 0x122   :  { %v791_v30 = vadd.f32 %v783_v26, %v778_v24  ;;  %v792_v31 = vadd.f32 %v784_v28, %v779_v47  ;;  %v793_v32 = vadd.f32 %v785_v43, %v780_v25  ;;  %v794_v33 = vadd.f32 %v786_v29, %v781_v8  ;;  %v2291_v29 = vld [vmem:[#allocation11 + $0x28] sm:$0xff] }
 0x124   :  { %v795_v34 = vmax.f32 %v791_v30, 0.0  ;;  %v796_v35 = vmax.f32 %v792_v31, 0.0  ;;  %v797_v63 = vmax.f32 %v793_v32, 0.0  ;;  %v798_v36 = vmax.f32 %v794_v33, 0.0  ;;  %v2299_v30 = vld [vmem:[#allocation11 + $0x68] sm:$0xff] }
 0x126   :  { %v799_v37 = vpack.c.bf16 %v795_v34, %v795_v34  ;;  %v800_v45 = vpack.c.bf16 %v796_v35, %v796_v35  ;;  %v801_v38 = vpack.c.bf16 %v797_v63, %v797_v63  ;;  %v802_v10 = vpack.c.bf16 %v798_v36, %v798_v36  ;;  %v2290_v63 = vld [vmem:[#allocation11 + $0x20] sm:$0xff] }
 0x127   :  { %v2298_v36 = vld [vmem:[#allocation11 + $0x60] sm:$0xff] }
 0x128   :  { %1195 = vmatmul.bf16.vlgmr.msra.gmra.mxu0 %v799_v37  ;;  %1208 = vmatmul.bf16.vlgmr.msra.gmra.mxu1 %v800_v45 }
 0x129   :  { %1221 = vmatmul.bf16.vlgmr.msra.gmra.mxu2 %v801_v38  ;;  %1234 = vmatmul.bf16.vlgmr.msra.gmra.mxu3 %v802_v10 }
 0x12a   :  { %1515 = vmatpush.bf16.msra.mxu0 %v2293_v15  ;;  %1528 = vmatpush.bf16.msra.mxu1 %v2301_v17 }
 0x12e   :  { %1516 = vmatpush.bf16.msra.mxu0 %v2292_v23  ;;  %1529 = vmatpush.bf16.msra.mxu1 %v2300_v27 }
 0x132   :  { %1517 = vmatpush.bf16.msra.mxu0 %v2291_v29  ;;  %1530 = vmatpush.bf16.msra.mxu1 %v2299_v30 }
 0x136   :  { %1518 = vmatpush.bf16.msra.mxu0 %v2290_v63  ;;  %1531 = vmatpush.bf16.msra.mxu1 %v2298_v36 }
 0x138   :  { %1247 = vmatmul.bf16.vlgmr.msrb.gmra.mxu0 %v799_v37  ;;  %1260 = vmatmul.bf16.vlgmr.msrb.gmra.mxu1 %v800_v45 }
 0x139   :  { %1273 = vmatmul.bf16.vlgmr.msrb.gmra.mxu2 %v801_v38  ;;  %1286 = vmatmul.bf16.vlgmr.msrb.gmra.mxu3 %v802_v10 }
 0x1a5   :  { %v1196_v20 = vpop.f32.mrf.mxu0  ;;  %v1209_v13 = vpop.f32.mrf.mxu1 }
 0x1a6   :  { %v1210_v39 = vadd.f32 %v1209_v13, %v1196_v20  ;;  %v2289_v20 = vld [vmem:[#allocation11 + $0x18] sm:$0xff] }
 0x1a7   :  { %v2297_v13 = vld [vmem:[#allocation11 + $0x58] sm:$0xff]  ;;  %1519 = vmatpush.bf16.msra.mxu0 %v2289_v20 }
 0x1a8   :  { %1532 = vmatpush.bf16.msra.mxu1 %v2297_v13 }
 0x1ac   :  { %v1222_v42 = vpop.f32.mrf.mxu2  ;;  %v1235_v46 = vpop.f32.mrf.mxu3 }
 0x1ad   :  { %v1223_v44 = vadd.f32 %v1222_v42, %v1210_v39  ;;  %v1198_v48 = vpop.f32.mrf.mxu0  ;;  %v1211_v50 = vpop.f32.mrf.mxu1 }
 0x1ae   :  { %v2296_v48 = vld [vmem:[#allocation11 + $0x50] sm:$0xff] }
 0x1af   :  { %v2757_v41 = vadd.f32 %v1235_v46, %v1223_v44  ;;  %v2288_v44 = vld [vmem:[#allocation11 + $0x10] sm:$0xff]  ;;  %1533 = vmatpush.bf16.msra.mxu1 %v2296_v48 }
 0x1b0   :  { %1520 = vmatpush.bf16.msra.mxu0 %v2288_v44 }
 0x1b1   :  { %v1293_v51 = vrot.slane %v2757_v41, 4  ;;  %v1307_v54 = vmul.f32 %v2757_v41, %v2757_v41 }
 0x1b3   :  { %v1294_v55 = vadd.f32 %v1293_v51, %v2757_v41  ;;  %v1309_v52 = vrot.slane %v1307_v54, 4 }
 0x1b4   :  { %v1224_v12 = vpop.f32.mrf.mxu2  ;;  %v1237_v56 = vpop.f32.mrf.mxu3 }
 0x1b5   :  { %v1295_v57 = vrot.slane %v1294_v55, 2  ;;  %v1310_v58 = vadd.f32 %v1309_v52, %v1307_v54  ;;  %v1248_v60 = vpop.f32.mrf.mxu0  ;;  %v1261_v61 = vpop.f32.mrf.mxu1  ;;  %v2287_v54 = vld [vmem:[#allocation11 + $0x8] sm:$0xff]  ;;  %v2286_v56 = vld [vmem:[#allocation11] sm:$0xff] }
 0x1b6   :  { %v1262_v4 = vadd.f32 %v1261_v61, %v1248_v60  ;;  %1521 = vmatpush.bf16.msra.mxu0 %v2287_v54 }
 0x1b7   :  { %v1296_v1 = vadd.f32 %v1295_v57, %v1294_v55  ;;  %v1311_v0 = vrot.slane %v1310_v58, 2  ;;  %v2295_v55 = vld [vmem:[#allocation11 + $0x48] sm:$0xff]  ;;  %v2294_v57 = vld [vmem:[#allocation11 + $0x40] sm:$0xff] }
 0x1b8   :  { %1534 = vmatpush.bf16.msra.mxu1 %v2295_v55 }
 0x1b9   :  { %v1297_v16 = vrot.slane %v1296_v1, 1  ;;  %v1312_v2 = vadd.f32 %v1311_v0, %v1310_v58 }
 0x1ba   :  { %1522 = vmatpush.bf16.msra.mxu0 %v2286_v56 }
 0x1bb   :  { %v1298_v49 = vadd.f32 %v1297_v16, %v1296_v1  ;;  %v1313_v3 = vrot.slane %v1312_v2, 1 }
 0x1bc   :  { %v1274_v5 = vpop.f32.mrf.mxu2  ;;  %v1287_v6 = vpop.f32.mrf.mxu3  ;;  %1535 = vmatpush.bf16.msra.mxu1 %v2294_v57 }
 0x1bd   :  { %v2764_v62 = vmul.f32 %v1298_v49, %v2619_v40  ;;  %v1314_v7 = vadd.f32 %v1313_v3, %v1312_v2  ;;  %v1275_v9 = vadd.f32 %v1274_v5, %v1262_v4  ;;  %v1250_v11 = vpop.f32.mrf.mxu0  ;;  %v1263_v14 = vpop.f32.mrf.mxu1  ;;  %v1291_v5 = vld [vmem:[%s2799_s5] sm:$0x3] }
 0x1bf   :  { %v1321_v59 = vmul.f32 %v1314_v7, %v2619_v40  ;;  %v1323_v53 = vmul.f32 %v2764_v62, %v2764_v62  ;;  %v2769_v18 = vadd.f32 %v1287_v6, %v1275_v9 }
 0x1c1   :  { %v1325_v19 = vsub.f32 %v1321_v59, %v1323_v53  ;;  %v1299_v21 = vrot.slane %v2769_v18, 4  ;;  %v1308_v22 = vmul.f32 %v2769_v18, %v2769_v18  ;;  %v1292_v53 = vld [vmem:[%s2800_s6] sm:$0x3] }
 0x1c3   :  { %v1300_v8 = vadd.f32 %v1299_v21, %v2769_v18  ;;  %v1315_v24 = vrot.slane %v1308_v22, 4  ;;  %v1327_v26 = vmax.f32 %v1325_v19, 0.0 }
 0x1c4   :  { %v1276_v47 = vpop.f32.mrf.mxu2  ;;  %v1289_v25 = vpop.f32.mrf.mxu3 }
 0x1c5   :  { %v1301_v28 = vrot.slane %v1300_v8, 2  ;;  %v1316_v43 = vadd.f32 %v1315_v24, %v1308_v22  ;;  %v1329_v33 = vadd.f32 1e-05, %v1327_v26 }
 0x1c7   :  { %v1302_v31 = vadd.f32 %v1301_v28, %v1300_v8  ;;  %v1317_v32 = vrot.slane %v1316_v43, 2  ;;  %2327 = vrsqrt.f32 %v1329_v33  ;;  %vm1337_vm4 = vweird.f32 %v1329_v33 }
 0x1c9   :  { %v1303_v34 = vrot.slane %v1302_v31, 1  ;;  %v1318_v35 = vadd.f32 %v1317_v32, %v1316_v43 }
 0x1cb   :  { %v1304_v37 = vadd.f32 %v1303_v34, %v1302_v31  ;;  %v1319_v45 = vrot.slane %v1318_v35, 1 }
 0x1cd   :  { %v1306_v38 = vmul.f32 %v1304_v37, %v2619_v40  ;;  %v1320_v10 = vadd.f32 %v1319_v45, %v1318_v35  ;;  %v2328_v50 = vpop.eup %2327 }
 0x1ce   :  { %v1332_v12 = vmul.f32 %v2328_v50, %v1329_v33  ;;  %vm1338_vm1 = vweird.f32 %v2328_v50 }
 0x1cf   :  { %v1322_v39 = vmul.f32 %v1320_v10, %v2619_v40  ;;  %v1324_v42 = vmul.f32 %v1306_v38, %v1306_v38  ;;  %vm1339_vm6 = vmor %vm1337_vm4, %vm1338_vm1 }
 0x1d0   :  { %v1333_v40 = vmul.f32 %v2328_v50, %v1332_v12 }
 0x1d1   :  { %v1326_v46 = vsub.f32 %v1322_v39, %v1324_v42 }
 0x1d2   :  { %v1334_v60 = vmul.f32 0.5, %v1333_v40 }
 0x1d3   :  { %v1328_v51 = vmax.f32 %v1326_v46, 0.0 }
 0x1d4   :  { %v1335_v0 = vsub.f32 1.5, %v1334_v60 }
 0x1d5   :  { %v1330_v52 = vadd.f32 1e-05, %v1328_v51 }
 0x1d6   :  { %v1336_v49 = vmul.f32 %v2328_v50, %v1335_v0 }
 0x1d7   :  { %2329 = vrsqrt.f32 %v1330_v52  ;;  %vm1347_vm2 = vweird.f32 %v1330_v52 }
 0x1d8   :  { %v1340_v7 = vsel %vm1339_vm6, %v2328_v50, %v1336_v49 }
 0x1dd   :  { %v2330_v58 = vpop.eup %2329 }
 0x1de   :  { %v1342_v61 = vmul.f32 %v2330_v58, %v1330_v52  ;;  %vm1348_vm0 = vweird.f32 %v2330_v58 }
 0x1df   :  { %vm1349_vm3 = vmor %vm1347_vm2, %vm1348_vm0 }
 0x1e0   :  { %v1343_v1 = vmul.f32 %v2330_v58, %v1342_v61 }
 0x1e2   :  { %v1344_v16 = vmul.f32 0.5, %v1343_v1 }
 0x1e4   :  { %v1345_v2 = vsub.f32 1.5, %v1344_v16 }
 0x1e6   :  { %v1346_v3 = vmul.f32 %v2330_v58, %v1345_v2 }
 0x1e8   :  { %v1350_v4 = vsel %vm1349_vm3, %v2330_v58, %v1346_v3 }
 0x1e9   :  { %v1353_v6 = vrot.slane %v1350_v4, 7 }
 0x1eb   :  { %v1354_v9 = vsel %vm745_vm5, %v1340_v7, %v1353_v6 }
 0x1ec   :  { %v1356_v11 = vmul.f32 %v1354_v9, %v1291_v5 }
 0x1ee   :  { %v1359_v14 = vperm.slane %v1356_v11, 1  ;;  %v1358_v15 = vperm.slane %v1356_v11, 0 }
 0x1f0   :  { %v1363_v17 = vmul.f32 %v1359_v14, %v1306_v38  ;;  %v1362_v19 = vmul.f32 %v1358_v15, %v2764_v62  ;;  %v1371_v23 = vmul.f32 %v1359_v14, %v2769_v18  ;;  %v1370_v27 = vmul.f32 %v1358_v15, %v2757_v41  ;;  %v2316_v62 = vld [vmem:[%s2802_s8] ss:$0 sm:$0xff]  ;;  %s1566_s8 = sshll.u32 %s2526_s22, 4  ;;  %s1567_s8 = int_to_ptr.vmem [resolvable:$true] %s1566_s8 }
 0x1f2   :  { %v1366_v59 = vrot.slane %v1363_v17, 7 }
 0x1f4   :  { %v1367_v21 = vsel %vm745_vm5, %v1362_v19, %v1366_v59 }
 0x1f5   :  { %v1369_v22 = vsub.f32 %v1292_v53, %v1367_v21 }
 0x1f7   :  { %v1373_v8 = vperm.slane %v1369_v22, 0  ;;  %v1374_v24 = vperm.slane %v1369_v22, 1 }
 0x1f9   :  { %v1377_v47 = vadd.f32 %v1373_v8, %v1370_v27  ;;  %v1378_v25 = vadd.f32 %v1374_v24, %v1371_v23 }
 0x1fb   :  { %v1379_v26 = vmax.f32 %v1377_v47, 0.0  ;;  %v1380_v28 = vmax.f32 %v1378_v25, 0.0 }
 0x1fd   :  { %v1381_v43 = vpack.c.bf16 %v1379_v26, %v1379_v26  ;;  %v1382_v29 = vpack.c.bf16 %v1380_v28, %v1380_v28 }
 0x1ff   :  { %1523 = vmatmul.bf16.vlgmr.msra.gmra.mxu0 %v1381_v43  ;;  %1536 = vmatmul.bf16.vlgmr.msra.gmra.mxu1 %v1382_v29 }
 0x27c   :  { %v1524_v30 = vpop.f32.mrf.mxu0  ;;  %v1537_v31 = vpop.f32.mrf.mxu1 }
 0x27d   :  { %v1525_v32 = vadd.f32 %v2316_v62, %v1524_v30 }
 0x27f   :  { %v1538_v18 = vadd.f32 %v1537_v31, %v1525_v32 }
 0x281   :  { %v2157_v33 = vmul.f32 -1.442695, %v1538_v18 }
 0x283   :  { %2331 = vpow2.f32 %v2157_v33 }
 0x284   :  { %v1526_v41 = vpop.f32.mrf.mxu0  ;;  %v1539_v34 = vpop.f32.mrf.mxu1 }
 0x289   :  { %v2332_v35 = vpop.eup %2331 }
 0x28a   :  { %v1544_v63 = vadd.f32 1.0, %v2332_v35 }
 0x28c   :  { %2333 = vrcp.f32 %v1544_v63  ;;  %v1556_v38 = vand.u32 2147483648, %v1544_v63  ;;  %v1554_v20 = vand.u32 2147483647, %v1544_v63  ;;  %vm1550_vm7 = vweird.f32 %v1544_v63 }
 0x28e   :  { %v1557_v39 = vor.u32 1.1754944e-38, %v1556_v38  ;;  %vm1555_vm9 = vcmp.eq.f32.partialorder %v1554_v20, 8.507059e+37 }
 0x292   :  { %v2334_v36 = vpop.eup %2333 }
 0x293   :  { %v1546_v37 = vmul.f32 %v2334_v36, %v1544_v63  ;;  %vm1551_vm5 = vweird.f32 %v2334_v36 }
 0x294   :  { %vm1552_vm8 = vmor %vm1550_vm7, %vm1551_vm5 }
 0x295   :  { %v1547_v45 = vsub.f32 1.0, %v1546_v37 }
 0x297   :  { %v1548_v10 = vmul.f32 %v2334_v36, %v1547_v45 }
 0x299   :  { %v1549_v13 = vadd.f32 %v2334_v36, %v1548_v10 }
 0x29b   :  { %v1553_v42 = vsel %vm1552_vm8, %v2334_v36, %v1549_v13 }
 0x29c   :  { %v1558_v46 = vsel %vm1555_vm9, %v1557_v39, %v1553_v42 }
 0x29d   :  { %1560 = vst [vmem:[#allocation13] sm:$0xff] %v1558_v46 }
 0x29e   :  { %1571 = dma.vmem_to_hbm [thread:$0]  %s1567_s8, 128, %s1569_s24, [#allocation4]  }
 0x29f   :  { %2511 = dma.done.wait [#allocation4], 128  }
 0x2a0   :  { %2512 = vsyncadd [#allocation4], 4294967168 }
 0x2a1   :  { %1576 = vsyncpa [#allocation3], 1 }
 0x2a2   :  { %1577 = vsyncpa [#allocation6], 1 }
 0x2a3   :  { %1578 = vsyncpa [#allocation9], 1 }
 0x2a4   :  { %1579 = vsyncpa [#allocation12], 1 }
 0x2a5   :  { %1580 = vsyncpa [#allocation4], 1 }

</bundles_post_ra>
